<compile_context>
chip_gen: v7x
topology: tpu7x:2x2x1
jax: 0.10.0
libtpu: 0.0.40
codegen_flags: <defaults>
</compile_context>

<pallas_src>
import functools
import math

import jax
import jax.numpy as jnp
from jax.experimental import pallas as pl
from jax.experimental.pallas import tpu as pltpu

EPS = 1e-5                       # PyTorch LayerNorm default eps
ACT_DTYPE = jnp.bfloat16         # inter-kernel activation dtype


def _tpu_vmem_bytes():
    try:
        info = pltpu.get_tpu_info()
        for attr in ("vmem_capacity_bytes", "vmem_bytes", "vmem_size_bytes"):
            v = getattr(info, attr, None)
            if v:
                return int(v)
    except Exception:
        pass
    return 64 * 1024 * 1024      # conservative (v7x-sized) default


_VMEM_PHYS = _tpu_vmem_bytes()
if _VMEM_PHYS >= 128 * 1024 * 1024:        # v5e / v6e
    VMEM_LIMIT_BYTES = 100 * 1024 * 1024
    ROW_TILE_TARGET = 1024
else:                                       # v7x (64 MiB per TensorCore)
    VMEM_LIMIT_BYTES = 48 * 1024 * 1024
    ROW_TILE_TARGET = 512


def _mosaic_params(grid_rank=1):
    return pltpu.CompilerParams(
        dimension_semantics=("parallel",) * grid_rank,
        vmem_limit_bytes=VMEM_LIMIT_BYTES)


def _round_up(n, m):
    return ((n + m - 1) // m) * m


def _row_plan(M):
    """Row tile (multiple of 16, bf16-friendly) and padded row count."""
    tm = min(ROW_TILE_TARGET, _round_up(M, 16))
    return tm, _round_up(M, tm)


def _pad_rows(x2d, Mp):
    M = x2d.shape[0]
    if Mp == M:
        return x2d
    return jnp.pad(x2d, ((0, Mp - M), (0, 0)))


def _hidden_chunk(H4):
    for c in (512, 384, 256, 128):
        if H4 % c == 0:
            return c
    return H4


# ----------------------------------------------------------------------------
# In-kernel math helpers (bf16 MXU operands, f32 accumulation / elementwise)
# ----------------------------------------------------------------------------
def _ln_f32(x, g, b):
    mean = jnp.mean(x, axis=-1, keepdims=True)
    xc = x - mean
    var = jnp.mean(xc * xc, axis=-1, keepdims=True)
    return xc * jax.lax.rsqrt(var + EPS) * g + b


def _ffn_core(x_f32, g, be, w1_ref, b1, w2_ref, b2, hidden_chunk):
    """FFN(LN(x)) with the 4D hidden dimension tiled in `hidden_chunk` columns."""
    h = _ln_f32(x_f32, g, be).astype(jnp.bfloat16)           # (tm, D) bf16
    H4 = w1_ref.shape[1]
    acc = b2 + jnp.zeros((x_f32.shape[0], w2_ref.shape[1]), jnp.float32)
    for c in range(0, H4, hidden_chunk):
        hc = jnp.dot(h, w1_ref[:, c:c + hidden_chunk],
                     preferred_element_type=jnp.float32) + b1[:, c:c + hidden_chunk]
        hc = jnp.maximum(hc, 0.0).astype(jnp.bfloat16)
        acc = acc + jnp.dot(hc, w2_ref[c:c + hidden_chunk, :],
                            preferred_element_type=jnp.float32)
    return acc


# ----------------------------------------------------------------------------
# Pallas kernels
# ----------------------------------------------------------------------------
def _linear_kernel(x_ref, w_ref, b_ref, o_ref):
    y = jnp.dot(x_ref[...].astype(jnp.bfloat16), w_ref[...],
                preferred_element_type=jnp.float32) + b_ref[...]
    o_ref[...] = y.astype(o_ref.dtype)


def _layernorm_kernel(x_ref, g_ref, b_ref, o_ref):
    x = x_ref[...].astype(jnp.float32)
    o_ref[...] = _ln_f32(x, g_ref[...], b_ref[...]).astype(o_ref.dtype)


def _ffn_res_kernel(x_ref, g_ref, be_ref, w1_ref, b1_ref, w2_ref, b2_ref, o_ref,
                    *, hidden_chunk):
    # out = x + FFN(LN(x))      (Dropout is eval-mode identity)
    x = x_ref[...].astype(jnp.float32)
    y = x + _ffn_core(x, g_ref[...], be_ref[...], w1_ref, b1_ref[...],
                      w2_ref, b2_ref[...], hidden_chunk)
    o_ref[...] = y.astype(o_ref.dtype)


def _ffn_res_norm_kernel(x_ref, g_ref, be_ref, w1_ref, b1_ref, w2_ref, b2_ref,
                         ng_ref, nb_ref, o_ref, *, hidden_chunk):
    # out = BlockLN(x + FFN(LN(x)))   (ffn2 + block LayerNorm epilogue fused)
    x = x_ref[...].astype(jnp.float32)
    y = x + _ffn_core(x, g_ref[...], be_ref[...], w1_ref, b1_ref[...],
                      w2_ref, b2_ref[...], hidden_chunk)
    o_ref[...] = _ln_f32(y, ng_ref[...], nb_ref[...]).astype(o_ref.dtype)


def _attn_res_kernel(x_ref, wqkv_ref, bqkv_ref, wo_ref, bo_ref, o_ref,
                     qkv_s, attn_s, *, num_heads):
    # Fused: QKV projection, per-head softmax attention, single fused output
    # projection, residual add.  One batch element per grid step.
    # 1/sqrt(dh) is already folded into Wq / bq at init time.
    x_bf = x_ref[0].astype(jnp.bfloat16)                   # (T, D)
    x_f32 = x_ref[0].astype(jnp.float32)
    D = x_bf.shape[-1]
    dh = D // num_heads

    # One wide (T, D) x (D, 3D) matmul for Q|K|V, staged in bf16 VMEM scratch.
    qkv_s[...] = (jnp.dot(x_bf, wqkv_ref[...], preferred_element_type=jnp.float32)
                  + bqkv_ref[...]).astype(jnp.bfloat16)

    for h in range(num_heads):                             # static unrolled loop
        q = qkv_s[:, h * dh:(h + 1) * dh]                  # (T, dh) bf16
        k = qkv_s[:, D + h * dh:D + (h + 1) * dh]
        v = qkv_s[:, 2 * D + h * dh:2 * D + (h + 1) * dh]
        s = jax.lax.dot_general(q, k, (((1,), (1,)), ((), ())),
                                preferred_element_type=jnp.float32)   # (T, T)
        m = jnp.max(s, axis=-1, keepdims=True)
        p = jnp.exp(s - m)
        inv = pl.reciprocal(jnp.sum(p, axis=-1, keepdims=True), approx=True)
        o_h = jnp.dot(p.astype(jnp.bfloat16), v,
                      preferred_element_type=jnp.float32)             # (T, dh)
        attn_s[:, h * dh:(h + 1) * dh] = o_h * inv         # normalize after PV

    # Single full-contraction output projection (K = D) + residual.
    proj = jnp.dot(attn_s[...].astype(jnp.bfloat16), wo_ref[...],
                   preferred_element_type=jnp.float32)
    o_ref[0] = (x_f32 + proj + bo_ref[...]).astype(o_ref.dtype)


def _conv_res_kernel(x_ref, w1_ref, b1_ref, w2_ref, b2_ref, o_ref, pad_s):
    # Fused conv module: Conv1d(k=3,pad=1) -> ReLU -> Conv1d(k=3,pad=1) -> +x.
    # Zero time-padding lives in a VMEM scratch; only the 8-row boundary
    # regions are zeroed (not the whole buffer).  Channels-last layout.
    x = x_ref[0].astype(jnp.float32)                       # (T, D)
    T = x.shape[0]
    D = pad_s.shape[1]

    pad_s[0:8, :] = jnp.zeros((8, D), pad_s.dtype)               # top boundary
    pad_s[8 + T:16 + T, :] = jnp.zeros((8, D), pad_s.dtype)      # bottom boundary
    pad_s[8:8 + T, :] = x                                  # stage at 8-aligned offset

    def conv3(w_ref, b_ref):
        return (jnp.dot(pad_s[7:7 + T, :].astype(jnp.bfloat16), w_ref[0],
                        preferred_element_type=jnp.float32) +        # x[t-1]
                jnp.dot(pad_s[8:8 + T, :].astype(jnp.bfloat16), w_ref[1],
                        preferred_element_type=jnp.float32) +        # x[t]
                jnp.dot(pad_s[9:9 + T, :].astype(jnp.bfloat16), w_ref[2],
                        preferred_element_type=jnp.float32) +        # x[t+1]
                b_ref[...])

    y = jnp.maximum(conv3(w1_ref, b1_ref), 0.0)
    pad_s[8:8 + T, :] = y                                  # boundary rows still zero
    y = conv3(w2_ref, b2_ref)
    o_ref[0] = (x + y).astype(o_ref.dtype)


# ----------------------------------------------------------------------------
# pallas_call wrappers
# ----------------------------------------------------------------------------
def linear(x2d, w, b):
    """x2d: (M, K); w: (K, N) bf16; b: (N,) -> (M, N) bf16.  M-tiled."""
    M, K = x2d.shape
    N = w.shape[1]
    tm, Mp = _row_plan(M)
    xp = _pad_rows(x2d, Mp)
    out = pl.pallas_call(
        _linear_kernel,
        out_shape=jax.ShapeDtypeStruct((Mp, N), ACT_DTYPE),
        grid=(Mp // tm,),
        in_specs=[pl.BlockSpec((tm, K), lambda i: (i, 0)),
                  pl.BlockSpec((K, N), lambda i: (0, 0)),
                  pl.BlockSpec((1, N), lambda i: (0, 0))],
        out_specs=pl.BlockSpec((tm, N), lambda i: (i, 0)),
        compiler_params=_mosaic_params(1),
    )(xp, w, b.reshape(1, N))
    return out[:M] if Mp != M else out


def layernorm(x2d, gamma, beta):
    M, D = x2d.shape
    tm, Mp = _row_plan(M)
    xp = _pad_rows(x2d, Mp)
    out = pl.pallas_call(
        _layernorm_kernel,
        out_shape=jax.ShapeDtypeStruct((Mp, D), jnp.float32),
        grid=(Mp // tm,),
        in_specs=[pl.BlockSpec((tm, D), lambda i: (i, 0)),
                  pl.BlockSpec((1, D), lambda i: (0, 0)),
                  pl.BlockSpec((1, D), lambda i: (0, 0))],
        out_specs=pl.BlockSpec((tm, D), lambda i: (i, 0)),
        compiler_params=_mosaic_params(1),
    )(xp, gamma.reshape(1, D), beta.reshape(1, D))
    return out[:M] if Mp != M else out


def ffn_residual(h2d, p, block_norm=None):
    """out = x + FFN(LN(x)); if block_norm=(g,b): out = LN_block(x + FFN(LN(x)))."""
    M, D = h2d.shape
    H4 = p["w1"].shape[1]
    chunk = _hidden_chunk(H4)
    tm, Mp = _row_plan(M)
    hp = _pad_rows(h2d, Mp)
    row = lambda i: (i, 0)
    cst = lambda i: (0, 0)
    in_specs = [pl.BlockSpec((tm, D), row),
                pl.BlockSpec((1, D), cst), pl.BlockSpec((1, D), cst),
                pl.BlockSpec((D, H4), cst), pl.BlockSpec((1, H4), cst),
                pl.BlockSpec((H4, D), cst), pl.BlockSpec((1, D), cst)]
    args = [hp, p["g"].reshape(1, D), p["b"].reshape(1, D),
            p["w1"], p["b1"].reshape(1, H4), p["w2"], p["b2"].reshape(1, D)]
    if block_norm is None:
        kernel = functools.partial(_ffn_res_kernel, hidden_chunk=chunk)
    else:
        kernel = functools.partial(_ffn_res_norm_kernel, hidden_chunk=chunk)
        ng, nb = block_norm
        in_specs += [pl.BlockSpec((1, D), cst), pl.BlockSpec((1, D), cst)]
        args += [ng.reshape(1, D), nb.reshape(1, D)]
    out = pl.pallas_call(
        kernel,
        out_shape=jax.ShapeDtypeStruct((Mp, D), ACT_DTYPE),
        grid=(Mp // tm,),
        in_specs=in_specs,
        out_specs=pl.BlockSpec((tm, D), row),
        compiler_params=_mosaic_params(1),
    )(*args)
    return out[:M] if Mp != M else out


def attention_residual(h2d, p, B, T, num_heads):
    """out = h + MHA(h) (batch_first MultiheadAttention, eval mode), fused."""
    D = h2d.shape[-1]
    x = h2d.reshape(B, T, D)
    out = pl.pallas_call(
        functools.partial(_attn_res_kernel, num_heads=num_heads),
        out_shape=jax.ShapeDtypeStruct((B, T, D), ACT_DTYPE),
        grid=(B,),
        in_specs=[pl.BlockSpec((1, T, D), lambda b: (b, 0, 0)),
                  pl.BlockSpec((D, 3 * D), lambda b: (0, 0)),
                  pl.BlockSpec((1, 3 * D), lambda b: (0, 0)),
                  pl.BlockSpec((D, D), lambda b: (0, 0)),
                  pl.BlockSpec((1, D), lambda b: (0, 0))],
        out_specs=pl.BlockSpec((1, T, D), lambda b: (b, 0, 0)),
        scratch_shapes=[pltpu.VMEM((T, 3 * D), jnp.bfloat16),
                        pltpu.VMEM((T, D), jnp.float32)],
        compiler_params=_mosaic_params(1),
    )(x, p["wqkv"], p["bqkv"].reshape(1, 3 * D), p["wo"], p["bo"].reshape(1, D))
    return out.reshape(B * T, D)


def conv_module_residual(h2d, p, B, T):
    """out = h + Conv1d(ReLU(Conv1d(h))), channels-last, padding handled in VMEM."""
    D = h2d.shape[-1]
    x = h2d.reshape(B, T, D)
    out = pl.pallas_call(
        _conv_res_kernel,
        out_shape=jax.ShapeDtypeStruct((B, T, D), ACT_DTYPE),
        grid=(B,),
        in_specs=[pl.BlockSpec((1, T, D), lambda b: (b, 0, 0)),
                  pl.BlockSpec((3, D, D), lambda b: (0, 0, 0)),
                  pl.BlockSpec((1, D), lambda b: (0, 0)),
                  pl.BlockSpec((3, D, D), lambda b: (0, 0, 0)),
                  pl.BlockSpec((1, D), lambda b: (0, 0))],
        out_specs=pl.BlockSpec((1, T, D), lambda b: (b, 0, 0)),
        scratch_shapes=[pltpu.VMEM((T + 16, D), jnp.float32)],
        compiler_params=_mosaic_params(1),
    )(x, p["cw1"], p["cb1"].reshape(1, D), p["cw2"], p["cb2"].reshape(1, D))
    return out.reshape(B * T, D)


# ----------------------------------------------------------------------------
# Model glue
# ----------------------------------------------------------------------------
def conformer_block(p, h, B, T, num_heads):
    """h: (B*T, D) -> (B*T, D).  4 fused pallas_calls per block."""
    h = attention_residual(h, p, B, T, num_heads)                  # h + attn
    h = ffn_residual(h, p["ffn1"])                                 # h + ffn1
    h = conv_module_residual(h, p, B, T)                           # h + conv
    h = ffn_residual(h, p["ffn2"], block_norm=(p["ng"], p["nb"]))  # LN(h + ffn2)
    return h


def conformer_encoder_forward(params, x, num_heads):
    B, T, F = x.shape
    D = params["in_w"].shape[1]
    h = linear(x.reshape(B * T, F), params["in_w"], params["in_b"])
    for lp in params["layers"]:
        h = conformer_block(lp, h, B, T, num_heads)
    h = layernorm(h, params["ln_g"], params["ln_b"])
    return h.reshape(B, T, D)


# ----------------------------------------------------------------------------
# Deterministic parameter init (torch __init__ shapes, converted to kernel layout)
# ----------------------------------------------------------------------------
class _KeyGen:
    def __init__(self, key):
        self.key = key

    def __call__(self):
        self.key, sub = jax.random.split(self.key)
        return sub


def init_encoder_params(key, input_dim, d_model, num_layers, num_heads):
    kg = _KeyGen(key)

    def w(shape, scale=0.02):
        return scale * jax.random.normal(kg(), shape, dtype=jnp.float32)

    def zeros(shape):
        return jnp.zeros(shape, jnp.float32)

    def ones(shape):
        return jnp.ones(shape, jnp.float32)

    bf = lambda a: a.astype(jnp.bfloat16)     # matmul weights live in bf16

    def ffn_params():
        return {
            "g": ones((d_model,)), "b": zeros((d_model,)),
            "w1": bf(w((4 * d_model, d_model)).T), "b1": w((4 * d_model,)),
            "w2": bf(w((d_model, 4 * d_model)).T), "b2": w((d_model,)),
        }

    params = {
        "in_w": bf(w((d_model, input_dim)).T),  # torch Linear (out,in) -> (in,out)
        "in_b": w((d_model,)),
        "ln_g": ones((d_model,)),
        "ln_b": zeros((d_model,)),
        "layers": [],
    }

    scale = 1.0 / math.sqrt(d_model // num_heads)
    for _ in range(num_layers):
        in_proj_w = w((3 * d_model, d_model))   # torch MHA in_proj_weight (3D, D)
        in_proj_b = w((3 * d_model,))
        # Fold the 1/sqrt(dh) attention scale into Wq / bq.
        in_proj_w = in_proj_w.at[:d_model].multiply(scale)
        in_proj_b = in_proj_b.at[:d_model].multiply(scale)
        cw1_t = w((d_model, d_model, 3))        # torch Conv1d weight (out, in, 3)
        cw2_t = w((d_model, d_model, 3))
        lp = {
            "wqkv": bf(in_proj_w.T),            # (D, 3D): columns = [Wq | Wk | Wv]
            "bqkv": in_proj_b,
            "wo": bf(w((d_model, d_model)).T), "bo": w((d_model,)),
            "ffn1": ffn_params(),
            "cw1": bf(jnp.transpose(cw1_t, (2, 1, 0))),   # (k, in, out)
            "cb1": w((d_model,)),
            "cw2": bf(jnp.transpose(cw2_t, (2, 1, 0))),
            "cb2": w((d_model,)),
            "ffn2": ffn_params(),
            "ng": ones((d_model,)), "nb": zeros((d_model,)),
        }
        params["layers"].append(lp)
    return params


# ----------------------------------------------------------------------------
if __name__ == "__main__":
    B, T = 2, 8
    input_dim, d_model, num_layers, num_heads = 16, 32, 2, 4

    root = jax.random.PRNGKey(0)
    k_param, k_x = jax.random.split(root)
    params = init_encoder_params(k_param, input_dim, d_model, num_layers, num_heads)
    x = jax.random.normal(k_x, (B, T, input_dim), dtype=jnp.float32)

    fwd = jax.jit(conformer_encoder_forward, static_argnums=2)
    out = fwd(params, x, num_heads)
    out = jax.block_until_ready(out)
    assert out.shape == (B, T, d_model)
    assert bool(jnp.all(jnp.isfinite(out)))
    print("KERNEL_OK")
</pallas_src>

<mosaic_0001>
module attributes {stable_mosaic.version = 11 : i64} {
  func.func @_ffn_res_kernel(%arg0: i32, %arg1: memref<16x32xbf16, #tpu.memory_space<vmem>>, %arg2: memref<1x32xf32, #tpu.memory_space<vmem>>, %arg3: memref<1x32xf32, #tpu.memory_space<vmem>>, %arg4: memref<32x128xbf16, #tpu.memory_space<vmem>>, %arg5: memref<1x128xf32, #tpu.memory_space<vmem>>, %arg6: memref<128x32xbf16, #tpu.memory_space<vmem>>, %arg7: memref<1x32xf32, #tpu.memory_space<vmem>>, %arg8: memref<16x32xbf16, #tpu.memory_space<vmem>>) attributes {dimension_semantics = [#tpu.dimension_semantics<parallel>], iteration_bounds = array<i64: 1>, scalar_prefetch = 0 : i64, scratch_operands = 0 : i64, tpu.core_type = #tpu.core_type<tc>, window_params = [{transform_indices = @transform_0, window_bounds = array<i64: 16, 32>}, {pipeline_mode = #tpu.pipeline_mode<synchronous>, transform_indices = @transform_1, window_bounds = array<i64: 1, 32>}, {pipeline_mode = #tpu.pipeline_mode<synchronous>, transform_indices = @transform_2, window_bounds = array<i64: 1, 32>}, {pipeline_mode = #tpu.pipeline_mode<synchronous>, transform_indices = @transform_3, window_bounds = array<i64: 32, 128>}, {pipeline_mode = #tpu.pipeline_mode<synchronous>, transform_indices = @transform_4, window_bounds = array<i64: 1, 128>}, {pipeline_mode = #tpu.pipeline_mode<synchronous>, transform_indices = @transform_5, window_bounds = array<i64: 128, 32>}, {pipeline_mode = #tpu.pipeline_mode<synchronous>, transform_indices = @transform_6, window_bounds = array<i64: 1, 32>}, {transform_indices = @transform_7, window_bounds = array<i64: 16, 32>}]} {
    %c0 = arith.constant 0 : index
    %c0_0 = arith.constant 0 : index
    %0 = vector.load %arg1[%c0, %c0_0] : memref<16x32xbf16, #tpu.memory_space<vmem>>, vector<16x32xbf16>
    %1 = arith.extf %0 : vector<16x32xbf16> to vector<16x32xf32>
    %c0_1 = arith.constant 0 : index
    %c0_2 = arith.constant 0 : index
    %2 = vector.load %arg2[%c0_1, %c0_2] : memref<1x32xf32, #tpu.memory_space<vmem>>, vector<1x32xf32>
    %c0_3 = arith.constant 0 : index
    %c0_4 = arith.constant 0 : index
    %3 = vector.load %arg3[%c0_3, %c0_4] : memref<1x32xf32, #tpu.memory_space<vmem>>, vector<1x32xf32>
    %c0_5 = arith.constant 0 : index
    %c0_6 = arith.constant 0 : index
    %4 = vector.load %arg5[%c0_5, %c0_6] : memref<1x128xf32, #tpu.memory_space<vmem>>, vector<1x128xf32>
    %c0_7 = arith.constant 0 : index
    %c0_8 = arith.constant 0 : index
    %5 = vector.load %arg7[%c0_7, %c0_8] : memref<1x32xf32, #tpu.memory_space<vmem>>, vector<1x32xf32>
    %cst = arith.constant dense<0.000000e+00> : vector<16xf32>
    %6 = vector.multi_reduction <add>, %1, %cst [1] : vector<16x32xf32> to vector<16xf32>
    %7 = vector.shape_cast %6 : vector<16xf32> to vector<16x1xf32>
    %cst_9 = arith.constant 3.200000e+01 : f32
    %8 = vector.broadcast %cst_9 : f32 to vector<16x1xf32>
    %9 = arith.divf %7, %8 : vector<16x1xf32>
    %10 = vector.broadcast %9 : vector<16x1xf32> to vector<16x32xf32>
    %11 = arith.subf %1, %10 : vector<16x32xf32>
    %12 = arith.mulf %11, %11 : vector<16x32xf32>
    %cst_10 = arith.constant dense<0.000000e+00> : vector<16xf32>
    %13 = vector.multi_reduction <add>, %12, %cst_10 [1] : vector<16x32xf32> to vector<16xf32>
    %14 = vector.shape_cast %13 : vector<16xf32> to vector<16x1xf32>
    %cst_11 = arith.constant 3.200000e+01 : f32
    %15 = vector.broadcast %cst_11 : f32 to vector<16x1xf32>
    %16 = arith.divf %14, %15 : vector<16x1xf32>
    %cst_12 = arith.constant 9.99999974E-6 : f32
    %17 = vector.broadcast %cst_12 : f32 to vector<16x1xf32>
    %18 = arith.addf %16, %17 : vector<16x1xf32>
    %19 = math.rsqrt %18 : vector<16x1xf32>
    %20 = vector.broadcast %19 : vector<16x1xf32> to vector<16x32xf32>
    %21 = arith.mulf %11, %20 : vector<16x32xf32>
    %22 = vector.broadcast %2 : vector<1x32xf32> to vector<16x32xf32>
    %23 = arith.mulf %21, %22 : vector<16x32xf32>
    %24 = vector.broadcast %3 : vector<1x32xf32> to vector<16x32xf32>
    %25 = arith.addf %23, %24 : vector<16x32xf32>
    %26 = arith.truncf %25 : vector<16x32xf32> to vector<16x32xbf16>
    %cst_13 = arith.constant 0.000000e+00 : f32
    %27 = vector.broadcast %cst_13 : f32 to vector<16x32xf32>
    %28 = vector.broadcast %5 : vector<1x32xf32> to vector<16x32xf32>
    %29 = arith.addf %28, %27 : vector<16x32xf32>
    %c0_14 = arith.constant 0 : index
    %c0_15 = arith.constant 0 : index
    %30 = vector.load %arg4[%c0_14, %c0_15] : memref<32x128xbf16, #tpu.memory_space<vmem>>, vector<32x128xbf16>
    %cst_16 = arith.constant dense<0.000000e+00> : vector<16x128xf32>
    %31 = tpu.matmul %26, %30, %cst_16 {dimension_numbers = #tpu.dot_dimension_numbers<[1], [0], [0], [1], [0, 0, 1, 1], [], []>} : vector<16x32xbf16>, vector<32x128xbf16>, vector<16x128xf32> -> vector<16x128xf32>
    %32 = vector.broadcast %4 : vector<1x128xf32> to vector<16x128xf32>
    %33 = arith.addf %31, %32 : vector<16x128xf32>
    %cst_17 = arith.constant 0.000000e+00 : f32
    %34 = vector.broadcast %cst_17 : f32 to vector<16x128xf32>
    %35 = arith.maximumf %33, %34 : vector<16x128xf32>
    %36 = arith.truncf %35 : vector<16x128xf32> to vector<16x128xbf16>
    %c0_18 = arith.constant 0 : index
    %c0_19 = arith.constant 0 : index
    %37 = vector.load %arg6[%c0_18, %c0_19] : memref<128x32xbf16, #tpu.memory_space<vmem>>, vector<128x32xbf16>
    %cst_20 = arith.constant dense<0.000000e+00> : vector<16x32xf32>
    %38 = tpu.matmul %36, %37, %cst_20 {dimension_numbers = #tpu.dot_dimension_numbers<[1], [0], [0], [1], [0, 0, 1, 1], [], []>} : vector<16x128xbf16>, vector<128x32xbf16>, vector<16x32xf32> -> vector<16x32xf32>
    %39 = arith.addf %29, %38 : vector<16x32xf32>
    %40 = arith.addf %1, %39 : vector<16x32xf32>
    %41 = arith.truncf %40 : vector<16x32xf32> to vector<16x32xbf16>
    %c0_21 = arith.constant 0 : index
    %c0_22 = arith.constant 0 : index
    %42 = vector.load %arg8[%c0_21, %c0_22] : memref<16x32xbf16, #tpu.memory_space<vmem>>, vector<16x32xbf16>
    tpu.vector_store %arg8[%c0_21, %c0_22], %41 {strides = array<i32>} : memref<16x32xbf16, #tpu.memory_space<vmem>>, vector<16x32xbf16>,
    return
  }
  func.func @transform_0(%arg0: i32) -> (i32, i32) {
    %c0_i32 = arith.constant 0 : i32
    %c0_i32_0 = arith.constant 0 : i32
    return %arg0, %c0_i32 : i32, i32
  }
  func.func @transform_1(%arg0: i32) -> (i32, i32) {
    %c0_i32 = arith.constant 0 : i32
    %c0_i32_0 = arith.constant 0 : i32
    %c0_i32_1 = arith.constant 0 : i32
    return %c0_i32, %c0_i32_0 : i32, i32
  }
  func.func @transform_2(%arg0: i32) -> (i32, i32) {
    %c0_i32 = arith.constant 0 : i32
    %c0_i32_0 = arith.constant 0 : i32
    %c0_i32_1 = arith.constant 0 : i32
    return %c0_i32, %c0_i32_0 : i32, i32
  }
  func.func @transform_3(%arg0: i32) -> (i32, i32) {
    %c0_i32 = arith.constant 0 : i32
    %c0_i32_0 = arith.constant 0 : i32
    %c0_i32_1 = arith.constant 0 : i32
    return %c0_i32, %c0_i32_0 : i32, i32
  }
  func.func @transform_4(%arg0: i32) -> (i32, i32) {
    %c0_i32 = arith.constant 0 : i32
    %c0_i32_0 = arith.constant 0 : i32
    %c0_i32_1 = arith.constant 0 : i32
    return %c0_i32, %c0_i32_0 : i32, i32
  }
  func.func @transform_5(%arg0: i32) -> (i32, i32) {
    %c0_i32 = arith.constant 0 : i32
    %c0_i32_0 = arith.constant 0 : i32
    %c0_i32_1 = arith.constant 0 : i32
    return %c0_i32, %c0_i32_0 : i32, i32
  }
  func.func @transform_6(%arg0: i32) -> (i32, i32) {
    %c0_i32 = arith.constant 0 : i32
    %c0_i32_0 = arith.constant 0 : i32
    %c0_i32_1 = arith.constant 0 : i32
    return %c0_i32, %c0_i32_0 : i32, i32
  }
  func.func @transform_7(%arg0: i32) -> (i32, i32) {
    %c0_i32 = arith.constant 0 : i32
    %c0_i32_0 = arith.constant 0 : i32
    return %arg0, %c0_i32 : i32, i32
  }
}

module attributes {stable_mosaic.version = 11 : i64} {
  func.func @_linear_kernel(%arg0: i32, %arg1: memref<16x16xf32, #tpu.memory_space<vmem>>, %arg2: memref<16x32xbf16, #tpu.memory_space<vmem>>, %arg3: memref<1x32xf32, #tpu.memory_space<vmem>>, %arg4: memref<16x32xbf16, #tpu.memory_space<vmem>>) attributes {dimension_semantics = [#tpu.dimension_semantics<parallel>], iteration_bounds = array<i64: 1>, scalar_prefetch = 0 : i64, scratch_operands = 0 : i64, tpu.core_type = #tpu.core_type<tc>, window_params = [{transform_indices = @transform_0, window_bounds = array<i64: 16, 16>}, {pipeline_mode = #tpu.pipeline_mode<synchronous>, transform_indices = @transform_1, window_bounds = array<i64: 16, 32>}, {pipeline_mode = #tpu.pipeline_mode<synchronous>, transform_indices = @transform_2, window_bounds = array<i64: 1, 32>}, {transform_indices = @transform_3, window_bounds = array<i64: 16, 32>}]} {
    %c0 = arith.constant 0 : index
    %c0_0 = arith.constant 0 : index
    %0 = vector.load %arg1[%c0, %c0_0] : memref<16x16xf32, #tpu.memory_space<vmem>>, vector<16x16xf32>
    %1 = arith.truncf %0 : vector<16x16xf32> to vector<16x16xbf16>
    %c0_1 = arith.constant 0 : index
    %c0_2 = arith.constant 0 : index
    %2 = vector.load %arg2[%c0_1, %c0_2] : memref<16x32xbf16, #tpu.memory_space<vmem>>, vector<16x32xbf16>
    %cst = arith.constant dense<0.000000e+00> : vector<16x32xf32>
    %3 = tpu.matmul %1, %2, %cst {dimension_numbers = #tpu.dot_dimension_numbers<[1], [0], [0], [1], [0, 0, 1, 1], [], []>} : vector<16x16xbf16>, vector<16x32xbf16>, vector<16x32xf32> -> vector<16x32xf32>
    %c0_3 = arith.constant 0 : index
    %c0_4 = arith.constant 0 : index
    %4 = vector.load %arg3[%c0_3, %c0_4] : memref<1x32xf32, #tpu.memory_space<vmem>>, vector<1x32xf32>
    %5 = vector.broadcast %4 : vector<1x32xf32> to vector<16x32xf32>
    %6 = arith.addf %3, %5 : vector<16x32xf32>
    %7 = arith.truncf %6 : vector<16x32xf32> to vector<16x32xbf16>
    %c0_5 = arith.constant 0 : index
    %c0_6 = arith.constant 0 : index
    %8 = vector.load %arg4[%c0_5, %c0_6] : memref<16x32xbf16, #tpu.memory_space<vmem>>, vector<16x32xbf16>
    tpu.vector_store %arg4[%c0_5, %c0_6], %7 {strides = array<i32>} : memref<16x32xbf16, #tpu.memory_space<vmem>>, vector<16x32xbf16>,
    return
  }
  func.func @transform_0(%arg0: i32) -> (i32, i32) {
    %c0_i32 = arith.constant 0 : i32
    %c0_i32_0 = arith.constant 0 : i32
    return %arg0, %c0_i32 : i32, i32
  }
  func.func @transform_1(%arg0: i32) -> (i32, i32) {
    %c0_i32 = arith.constant 0 : i32
    %c0_i32_0 = arith.constant 0 : i32
    %c0_i32_1 = arith.constant 0 : i32
    return %c0_i32, %c0_i32_0 : i32, i32
  }
  func.func @transform_2(%arg0: i32) -> (i32, i32) {
    %c0_i32 = arith.constant 0 : i32
    %c0_i32_0 = arith.constant 0 : i32
    %c0_i32_1 = arith.constant 0 : i32
    return %c0_i32, %c0_i32_0 : i32, i32
  }
  func.func @transform_3(%arg0: i32) -> (i32, i32) {
    %c0_i32 = arith.constant 0 : i32
    %c0_i32_0 = arith.constant 0 : i32
    return %arg0, %c0_i32 : i32, i32
  }
}

module attributes {stable_mosaic.version = 11 : i64} {
  func.func @_attn_res_kernel(%arg0: i32, %arg1: memref<1x8x32xbf16, #tpu.memory_space<vmem>>, %arg2: memref<32x96xbf16, #tpu.memory_space<vmem>>, %arg3: memref<1x96xf32, #tpu.memory_space<vmem>>, %arg4: memref<32x32xbf16, #tpu.memory_space<vmem>>, %arg5: memref<1x32xf32, #tpu.memory_space<vmem>>, %arg6: memref<1x8x32xbf16, #tpu.memory_space<vmem>>, %arg7: memref<8x96xbf16, #tpu.memory_space<vmem>>, %arg8: memref<8x32xf32, #tpu.memory_space<vmem>>) attributes {dimension_semantics = [#tpu.dimension_semantics<parallel>], iteration_bounds = array<i64: 2>, scalar_prefetch = 0 : i64, scratch_operands = 2 : i64, tpu.core_type = #tpu.core_type<tc>, window_params = [{transform_indices = @transform_0, window_bounds = array<i64: 1, 8, 32>}, {pipeline_mode = #tpu.pipeline_mode<synchronous>, transform_indices = @transform_1, window_bounds = array<i64: 32, 96>}, {pipeline_mode = #tpu.pipeline_mode<synchronous>, transform_indices = @transform_2, window_bounds = array<i64: 1, 96>}, {pipeline_mode = #tpu.pipeline_mode<synchronous>, transform_indices = @transform_3, window_bounds = array<i64: 32, 32>}, {pipeline_mode = #tpu.pipeline_mode<synchronous>, transform_indices = @transform_4, window_bounds = array<i64: 1, 32>}, {transform_indices = @transform_5, window_bounds = array<i64: 1, 8, 32>}]} {
    %c0 = arith.constant 0 : index
    %c0_0 = arith.constant 0 : index
    %c0_1 = arith.constant 0 : index
    %0 = vector.load %arg1[%c0, %c0_0, %c0_1] : memref<1x8x32xbf16, #tpu.memory_space<vmem>>, vector<1x8x32xbf16>
    %1 = vector.shape_cast %0 : vector<1x8x32xbf16> to vector<8x32xbf16>
    %c0_2 = arith.constant 0 : index
    %c0_3 = arith.constant 0 : index
    %c0_4 = arith.constant 0 : index
    %2 = vector.load %arg1[%c0_2, %c0_3, %c0_4] : memref<1x8x32xbf16, #tpu.memory_space<vmem>>, vector<1x8x32xbf16>
    %3 = vector.shape_cast %2 : vector<1x8x32xbf16> to vector<8x32xbf16>
    %4 = arith.extf %3 : vector<8x32xbf16> to vector<8x32xf32>
    %c0_5 = arith.constant 0 : index
    %c0_6 = arith.constant 0 : index
    %5 = vector.load %arg2[%c0_5, %c0_6] : memref<32x96xbf16, #tpu.memory_space<vmem>>, vector<32x96xbf16>
    %cst = arith.constant dense<0.000000e+00> : vector<8x96xf32>
    %6 = tpu.matmul %1, %5, %cst {dimension_numbers = #tpu.dot_dimension_numbers<[1], [0], [0], [1], [0, 0, 1, 1], [], []>} : vector<8x32xbf16>, vector<32x96xbf16>, vector<8x96xf32> -> vector<8x96xf32>
    %c0_7 = arith.constant 0 : index
    %c0_8 = arith.constant 0 : index
    %7 = vector.load %arg3[%c0_7, %c0_8] : memref<1x96xf32, #tpu.memory_space<vmem>>, vector<1x96xf32>
    %8 = vector.broadcast %7 : vector<1x96xf32> to vector<8x96xf32>
    %9 = arith.addf %6, %8 : vector<8x96xf32>
    %10 = arith.truncf %9 : vector<8x96xf32> to vector<8x96xbf16>
    %c0_9 = arith.constant 0 : index
    %c0_10 = arith.constant 0 : index
    %11 = vector.load %arg7[%c0_9, %c0_10] : memref<8x96xbf16, #tpu.memory_space<vmem>>, vector<8x96xbf16>
    tpu.vector_store %arg7[%c0_9, %c0_10], %10 {strides = array<i32>} : memref<8x96xbf16, #tpu.memory_space<vmem>>, vector<8x96xbf16>,
    %c0_11 = arith.constant 0 : index
    %c0_12 = arith.constant 0 : index
    %12 = vector.load %arg7[%c0_11, %c0_12] : memref<8x96xbf16, #tpu.memory_space<vmem>>, vector<8x8xbf16>
    %c0_13 = arith.constant 0 : index
    %c32 = arith.constant 32 : index
    %13 = vector.load %arg7[%c0_13, %c32] : memref<8x96xbf16, #tpu.memory_space<vmem>>, vector<8x8xbf16>
    %c0_14 = arith.constant 0 : index
    %c64 = arith.constant 64 : index
    %14 = vector.load %arg7[%c0_14, %c64] : memref<8x96xbf16, #tpu.memory_space<vmem>>, vector<8x8xbf16>
    %cst_15 = arith.constant dense<0.000000e+00> : vector<8x8xf32>
    %15 = tpu.matmul %12, %13, %cst_15 {dimension_numbers = #tpu.dot_dimension_numbers<[1], [1], [0], [0], [0, 0, 1, 0], [], []>} : vector<8x8xbf16>, vector<8x8xbf16>, vector<8x8xf32> -> vector<8x8xf32>
    %cst_16 = arith.constant dense<0xFF800000> : vector<8xf32>
    %16 = vector.multi_reduction <maximumf>, %15, %cst_16 [1] : vector<8x8xf32> to vector<8xf32>
    %17 = vector.shape_cast %16 : vector<8xf32> to vector<8x1xf32>
    %18 = vector.broadcast %17 : vector<8x1xf32> to vector<8x8xf32>
    %19 = arith.subf %15, %18 : vector<8x8xf32>
    %20 = math.exp %19 : vector<8x8xf32>
    %cst_17 = arith.constant dense<0.000000e+00> : vector<8xf32>
    %21 = vector.multi_reduction <add>, %20, %cst_17 [1] : vector<8x8xf32> to vector<8xf32>
    %22 = vector.shape_cast %21 : vector<8xf32> to vector<8x1xf32>
    %23 = tpu.reciprocal %22 {approx = true} : vector<8x1xf32> -> vector<8x1xf32>
    %24 = arith.truncf %20 : vector<8x8xf32> to vector<8x8xbf16>
    %cst_18 = arith.constant dense<0.000000e+00> : vector<8x8xf32>
    %25 = tpu.matmul %24, %14, %cst_18 {dimension_numbers = #tpu.dot_dimension_numbers<[1], [0], [0], [1], [0, 0, 1, 1], [], []>} : vector<8x8xbf16>, vector<8x8xbf16>, vector<8x8xf32> -> vector<8x8xf32>
    %26 = vector.broadcast %23 : vector<8x1xf32> to vector<8x8xf32>
    %27 = arith.mulf %25, %26 : vector<8x8xf32>
    %c0_19 = arith.constant 0 : index
    %c0_20 = arith.constant 0 : index
    %28 = vector.load %arg8[%c0_19, %c0_20] : memref<8x32xf32, #tpu.memory_space<vmem>>, vector<8x8xf32>
    tpu.vector_store %arg8[%c0_19, %c0_20], %27 {strides = array<i32>} : memref<8x32xf32, #tpu.memory_space<vmem>>, vector<8x8xf32>,
    %c0_21 = arith.constant 0 : index
    %c8 = arith.constant 8 : index
    %29 = vector.load %arg7[%c0_21, %c8] : memref<8x96xbf16, #tpu.memory_space<vmem>>, vector<8x8xbf16>
    %c0_22 = arith.constant 0 : index
    %c40 = arith.constant 40 : index
    %30 = vector.load %arg7[%c0_22, %c40] : memref<8x96xbf16, #tpu.memory_space<vmem>>, vector<8x8xbf16>
    %c0_23 = arith.constant 0 : index
    %c72 = arith.constant 72 : index
    %31 = vector.load %arg7[%c0_23, %c72] : memref<8x96xbf16, #tpu.memory_space<vmem>>, vector<8x8xbf16>
    %cst_24 = arith.constant dense<0.000000e+00> : vector<8x8xf32>
    %32 = tpu.matmul %29, %30, %cst_24 {dimension_numbers = #tpu.dot_dimension_numbers<[1], [1], [0], [0], [0, 0, 1, 0], [], []>} : vector<8x8xbf16>, vector<8x8xbf16>, vector<8x8xf32> -> vector<8x8xf32>
    %cst_25 = arith.constant dense<0xFF800000> : vector<8xf32>
    %33 = vector.multi_reduction <maximumf>, %32, %cst_25 [1] : vector<8x8xf32> to vector<8xf32>
    %34 = vector.shape_cast %33 : vector<8xf32> to vector<8x1xf32>
    %35 = vector.broadcast %34 : vector<8x1xf32> to vector<8x8xf32>
    %36 = arith.subf %32, %35 : vector<8x8xf32>
    %37 = math.exp %36 : vector<8x8xf32>
    %cst_26 = arith.constant dense<0.000000e+00> : vector<8xf32>
    %38 = vector.multi_reduction <add>, %37, %cst_26 [1] : vector<8x8xf32> to vector<8xf32>
    %39 = vector.shape_cast %38 : vector<8xf32> to vector<8x1xf32>
    %40 = tpu.reciprocal %39 {approx = true} : vector<8x1xf32> -> vector<8x1xf32>
    %41 = arith.truncf %37 : vector<8x8xf32> to vector<8x8xbf16>
    %cst_27 = arith.constant dense<0.000000e+00> : vector<8x8xf32>
    %42 = tpu.matmul %41, %31, %cst_27 {dimension_numbers = #tpu.dot_dimension_numbers<[1], [0], [0], [1], [0, 0, 1, 1], [], []>} : vector<8x8xbf16>, vector<8x8xbf16>, vector<8x8xf32> -> vector<8x8xf32>
    %43 = vector.broadcast %40 : vector<8x1xf32> to vector<8x8xf32>
    %44 = arith.mulf %42, %43 : vector<8x8xf32>
    %c0_28 = arith.constant 0 : index
    %c8_29 = arith.constant 8 : index
    %45 = vector.load %arg8[%c0_28, %c8_29] : memref<8x32xf32, #tpu.memory_space<vmem>>, vector<8x8xf32>
    tpu.vector_store %arg8[%c0_28, %c8_29], %44 {strides = array<i32>} : memref<8x32xf32, #tpu.memory_space<vmem>>, vector<8x8xf32>,
    %c0_30 = arith.constant 0 : index
    %c16 = arith.constant 16 : index
    %46 = vector.load %arg7[%c0_30, %c16] : memref<8x96xbf16, #tpu.memory_space<vmem>>, vector<8x8xbf16>
    %c0_31 = arith.constant 0 : index
    %c48 = arith.constant 48 : index
    %47 = vector.load %arg7[%c0_31, %c48] : memref<8x96xbf16, #tpu.memory_space<vmem>>, vector<8x8xbf16>
    %c0_32 = arith.constant 0 : index
    %c80 = arith.constant 80 : index
    %48 = vector.load %arg7[%c0_32, %c80] : memref<8x96xbf16, #tpu.memory_space<vmem>>, vector<8x8xbf16>
    %cst_33 = arith.constant dense<0.000000e+00> : vector<8x8xf32>
    %49 = tpu.matmul %46, %47, %cst_33 {dimension_numbers = #tpu.dot_dimension_numbers<[1], [1], [0], [0], [0, 0, 1, 0], [], []>} : vector<8x8xbf16>, vector<8x8xbf16>, vector<8x8xf32> -> vector<8x8xf32>
    %cst_34 = arith.constant dense<0xFF800000> : vector<8xf32>
    %50 = vector.multi_reduction <maximumf>, %49, %cst_34 [1] : vector<8x8xf32> to vector<8xf32>
    %51 = vector.shape_cast %50 : vector<8xf32> to vector<8x1xf32>
    %52 = vector.broadcast %51 : vector<8x1xf32> to vector<8x8xf32>
    %53 = arith.subf %49, %52 : vector<8x8xf32>
    %54 = math.exp %53 : vector<8x8xf32>
    %cst_35 = arith.constant dense<0.000000e+00> : vector<8xf32>
    %55 = vector.multi_reduction <add>, %54, %cst_35 [1] : vector<8x8xf32> to vector<8xf32>
    %56 = vector.shape_cast %55 : vector<8xf32> to vector<8x1xf32>
    %57 = tpu.reciprocal %56 {approx = true} : vector<8x1xf32> -> vector<8x1xf32>
    %58 = arith.truncf %54 : vector<8x8xf32> to vector<8x8xbf16>
    %cst_36 = arith.constant dense<0.000000e+00> : vector<8x8xf32>
    %59 = tpu.matmul %58, %48, %cst_36 {dimension_numbers = #tpu.dot_dimension_numbers<[1], [0], [0], [1], [0, 0, 1, 1], [], []>} : vector<8x8xbf16>, vector<8x8xbf16>, vector<8x8xf32> -> vector<8x8xf32>
    %60 = vector.broadcast %57 : vector<8x1xf32> to vector<8x8xf32>
    %61 = arith.mulf %59, %60 : vector<8x8xf32>
    %c0_37 = arith.constant 0 : index
    %c16_38 = arith.constant 16 : index
    %62 = vector.load %arg8[%c0_37, %c16_38] : memref<8x32xf32, #tpu.memory_space<vmem>>, vector<8x8xf32>
    tpu.vector_store %arg8[%c0_37, %c16_38], %61 {strides = array<i32>} : memref<8x32xf32, #tpu.memory_space<vmem>>, vector<8x8xf32>,
    %c0_39 = arith.constant 0 : index
    %c24 = arith.constant 24 : index
    %63 = vector.load %arg7[%c0_39, %c24] : memref<8x96xbf16, #tpu.memory_space<vmem>>, vector<8x8xbf16>
    %c0_40 = arith.constant 0 : index
    %c56 = arith.constant 56 : index
    %64 = vector.load %arg7[%c0_40, %c56] : memref<8x96xbf16, #tpu.memory_space<vmem>>, vector<8x8xbf16>
    %c0_41 = arith.constant 0 : index
    %c88 = arith.constant 88 : index
    %65 = vector.load %arg7[%c0_41, %c88] : memref<8x96xbf16, #tpu.memory_space<vmem>>, vector<8x8xbf16>
    %cst_42 = arith.constant dense<0.000000e+00> : vector<8x8xf32>
    %66 = tpu.matmul %63, %64, %cst_42 {dimension_numbers = #tpu.dot_dimension_numbers<[1], [1], [0], [0], [0, 0, 1, 0], [], []>} : vector<8x8xbf16>, vector<8x8xbf16>, vector<8x8xf32> -> vector<8x8xf32>
    %cst_43 = arith.constant dense<0xFF800000> : vector<8xf32>
    %67 = vector.multi_reduction <maximumf>, %66, %cst_43 [1] : vector<8x8xf32> to vector<8xf32>
    %68 = vector.shape_cast %67 : vector<8xf32> to vector<8x1xf32>
    %69 = vector.broadcast %68 : vector<8x1xf32> to vector<8x8xf32>
    %70 = arith.subf %66, %69 : vector<8x8xf32>
    %71 = math.exp %70 : vector<8x8xf32>
    %cst_44 = arith.constant dense<0.000000e+00> : vector<8xf32>
    %72 = vector.multi_reduction <add>, %71, %cst_44 [1] : vector<8x8xf32> to vector<8xf32>
    %73 = vector.shape_cast %72 : vector<8xf32> to vector<8x1xf32>
    %74 = tpu.reciprocal %73 {approx = true} : vector<8x1xf32> -> vector<8x1xf32>
    %75 = arith.truncf %71 : vector<8x8xf32> to vector<8x8xbf16>
    %cst_45 = arith.constant dense<0.000000e+00> : vector<8x8xf32>
    %76 = tpu.matmul %75, %65, %cst_45 {dimension_numbers = #tpu.dot_dimension_numbers<[1], [0], [0], [1], [0, 0, 1, 1], [], []>} : vector<8x8xbf16>, vector<8x8xbf16>, vector<8x8xf32> -> vector<8x8xf32>
    %77 = vector.broadcast %74 : vector<8x1xf32> to vector<8x8xf32>
    %78 = arith.mulf %76, %77 : vector<8x8xf32>
    %c0_46 = arith.constant 0 : index
    %c24_47 = arith.constant 24 : index
    %79 = vector.load %arg8[%c0_46, %c24_47] : memref<8x32xf32, #tpu.memory_space<vmem>>, vector<8x8xf32>
    tpu.vector_store %arg8[%c0_46, %c24_47], %78 {strides = array<i32>} : memref<8x32xf32, #tpu.memory_space<vmem>>, vector<8x8xf32>,
    %c0_48 = arith.constant 0 : index
    %c0_49 = arith.constant 0 : index
    %80 = vector.load %arg8[%c0_48, %c0_49] : memref<8x32xf32, #tpu.memory_space<vmem>>, vector<8x32xf32>
    %81 = arith.truncf %80 : vector<8x32xf32> to vector<8x32xbf16>
    %c0_50 = arith.constant 0 : index
    %c0_51 = arith.constant 0 : index
    %82 = vector.load %arg4[%c0_50, %c0_51] : memref<32x32xbf16, #tpu.memory_space<vmem>>, vector<32x32xbf16>
    %cst_52 = arith.constant dense<0.000000e+00> : vector<8x32xf32>
    %83 = tpu.matmul %81, %82, %cst_52 {dimension_numbers = #tpu.dot_dimension_numbers<[1], [0], [0], [1], [0, 0, 1, 1], [], []>} : vector<8x32xbf16>, vector<32x32xbf16>, vector<8x32xf32> -> vector<8x32xf32>
    %84 = arith.addf %4, %83 : vector<8x32xf32>
    %c0_53 = arith.constant 0 : index
    %c0_54 = arith.constant 0 : index
    %85 = vector.load %arg5[%c0_53, %c0_54] : memref<1x32xf32, #tpu.memory_space<vmem>>, vector<1x32xf32>
    %86 = vector.broadcast %85 : vector<1x32xf32> to vector<8x32xf32>
    %87 = arith.addf %84, %86 : vector<8x32xf32>
    %88 = arith.truncf %87 : vector<8x32xf32> to vector<8x32xbf16>
    %c0_55 = arith.constant 0 : index
    %c0_56 = arith.constant 0 : index
    %c0_57 = arith.constant 0 : index
    %89 = vector.load %arg6[%c0_55, %c0_56, %c0_57] : memref<1x8x32xbf16, #tpu.memory_space<vmem>>, vector<1x8x32xbf16>
    %90 = vector.shape_cast %89 : vector<1x8x32xbf16> to vector<8x32xbf16>
    %91 = vector.shape_cast %88 : vector<8x32xbf16> to vector<1x8x32xbf16>
    tpu.vector_store %arg6[%c0_55, %c0_56, %c0_57], %91 {strides = array<i32>} : memref<1x8x32xbf16, #tpu.memory_space<vmem>>, vector<1x8x32xbf16>,
    return
  }
  func.func @transform_0(%arg0: i32) -> (i32, i32, i32) {
    %c0_i32 = arith.constant 0 : i32
    %c0_i32_0 = arith.constant 0 : i32
    %c0_i32_1 = arith.constant 0 : i32
    return %arg0, %c0_i32, %c0_i32_0 : i32, i32, i32
  }
  func.func @transform_1(%arg0: i32) -> (i32, i32) {
    %c0_i32 = arith.constant 0 : i32
    %c0_i32_0 = arith.constant 0 : i32
    %c0_i32_1 = arith.constant 0 : i32
    return %c0_i32, %c0_i32_0 : i32, i32
  }
  func.func @transform_2(%arg0: i32) -> (i32, i32) {
    %c0_i32 = arith.constant 0 : i32
    %c0_i32_0 = arith.constant 0 : i32
    %c0_i32_1 = arith.constant 0 : i32
    return %c0_i32, %c0_i32_0 : i32, i32
  }
  func.func @transform_3(%arg0: i32) -> (i32, i32) {
    %c0_i32 = arith.constant 0 : i32
    %c0_i32_0 = arith.constant 0 : i32
    %c0_i32_1 = arith.constant 0 : i32
    return %c0_i32, %c0_i32_0 : i32, i32
  }
  func.func @transform_4(%arg0: i32) -> (i32, i32) {
    %c0_i32 = arith.constant 0 : i32
    %c0_i32_0 = arith.constant 0 : i32
    %c0_i32_1 = arith.constant 0 : i32
    return %c0_i32, %c0_i32_0 : i32, i32
  }
  func.func @transform_5(%arg0: i32) -> (i32, i32, i32) {
    %c0_i32 = arith.constant 0 : i32
    %c0_i32_0 = arith.constant 0 : i32
    %c0_i32_1 = arith.constant 0 : i32
    return %arg0, %c0_i32, %c0_i32_0 : i32, i32, i32
  }
}

module attributes {stable_mosaic.version = 11 : i64} {
  func.func @_conv_res_kernel(%arg0: i32, %arg1: memref<1x8x32xbf16, #tpu.memory_space<vmem>>, %arg2: memref<3x32x32xbf16, #tpu.memory_space<vmem>>, %arg3: memref<1x32xf32, #tpu.memory_space<vmem>>, %arg4: memref<3x32x32xbf16, #tpu.memory_space<vmem>>, %arg5: memref<1x32xf32, #tpu.memory_space<vmem>>, %arg6: memref<1x8x32xbf16, #tpu.memory_space<vmem>>, %arg7: memref<24x32xf32, #tpu.memory_space<vmem>>) attributes {dimension_semantics = [#tpu.dimension_semantics<parallel>], iteration_bounds = array<i64: 2>, scalar_prefetch = 0 : i64, scratch_operands = 1 : i64, tpu.core_type = #tpu.core_type<tc>, window_params = [{transform_indices = @transform_0, window_bounds = array<i64: 1, 8, 32>}, {pipeline_mode = #tpu.pipeline_mode<synchronous>, transform_indices = @transform_1, window_bounds = array<i64: 3, 32, 32>}, {pipeline_mode = #tpu.pipeline_mode<synchronous>, transform_indices = @transform_2, window_bounds = array<i64: 1, 32>}, {pipeline_mode = #tpu.pipeline_mode<synchronous>, transform_indices = @transform_3, window_bounds = array<i64: 3, 32, 32>}, {pipeline_mode = #tpu.pipeline_mode<synchronous>, transform_indices = @transform_4, window_bounds = array<i64: 1, 32>}, {transform_indices = @transform_5, window_bounds = array<i64: 1, 8, 32>}]} {
    %c0 = arith.constant 0 : index
    %c0_0 = arith.constant 0 : index
    %c0_1 = arith.constant 0 : index
    %0 = vector.load %arg1[%c0, %c0_0, %c0_1] : memref<1x8x32xbf16, #tpu.memory_space<vmem>>, vector<1x8x32xbf16>
    %1 = vector.shape_cast %0 : vector<1x8x32xbf16> to vector<8x32xbf16>
    %2 = arith.extf %1 : vector<8x32xbf16> to vector<8x32xf32>
    %cst = arith.constant 0.000000e+00 : f32
    %3 = vector.broadcast %cst : f32 to vector<8x32xf32>
    %c0_2 = arith.constant 0 : index
    %c0_3 = arith.constant 0 : index
    %4 = vector.load %arg7[%c0_2, %c0_3] : memref<24x32xf32, #tpu.memory_space<vmem>>, vector<8x32xf32>
    tpu.vector_store %arg7[%c0_2, %c0_3], %3 {strides = array<i32>} : memref<24x32xf32, #tpu.memory_space<vmem>>, vector<8x32xf32>,
    %cst_4 = arith.constant 0.000000e+00 : f32
    %5 = vector.broadcast %cst_4 : f32 to vector<8x32xf32>
    %c16 = arith.constant 16 : index
    %c0_5 = arith.constant 0 : index
    %6 = vector.load %arg7[%c16, %c0_5] : memref<24x32xf32, #tpu.memory_space<vmem>>, vector<8x32xf32>
    tpu.vector_store %arg7[%c16, %c0_5], %5 {strides = array<i32>} : memref<24x32xf32, #tpu.memory_space<vmem>>, vector<8x32xf32>,
    %c8 = arith.constant 8 : index
    %c0_6 = arith.constant 0 : index
    %7 = vector.load %arg7[%c8, %c0_6] : memref<24x32xf32, #tpu.memory_space<vmem>>, vector<8x32xf32>
    tpu.vector_store %arg7[%c8, %c0_6], %2 {strides = array<i32>} : memref<24x32xf32, #tpu.memory_space<vmem>>, vector<8x32xf32>,
    %c7 = arith.constant 7 : index
    %c0_7 = arith.constant 0 : index
    %8 = vector.load %arg7[%c7, %c0_7] : memref<24x32xf32, #tpu.memory_space<vmem>>, vector<8x32xf32>
    %9 = arith.truncf %8 : vector<8x32xf32> to vector<8x32xbf16>
    %c0_8 = arith.constant 0 : index
    %c0_9 = arith.constant 0 : index
    %c0_10 = arith.constant 0 : index
    %10 = vector.load %arg2[%c0_8, %c0_9, %c0_10] : memref<3x32x32xbf16, #tpu.memory_space<vmem>>, vector<1x32x32xbf16>
    %11 = vector.shape_cast %10 : vector<1x32x32xbf16> to vector<32x32xbf16>
    %cst_11 = arith.constant dense<0.000000e+00> : vector<8x32xf32>
    %12 = tpu.matmul %9, %11, %cst_11 {dimension_numbers = #tpu.dot_dimension_numbers<[1], [0], [0], [1], [0, 0, 1, 1], [], []>} : vector<8x32xbf16>, vector<32x32xbf16>, vector<8x32xf32> -> vector<8x32xf32>
    %c8_12 = arith.constant 8 : index
    %c0_13 = arith.constant 0 : index
    %13 = vector.load %arg7[%c8_12, %c0_13] : memref<24x32xf32, #tpu.memory_space<vmem>>, vector<8x32xf32>
    %14 = arith.truncf %13 : vector<8x32xf32> to vector<8x32xbf16>
    %c1 = arith.constant 1 : index
    %c0_14 = arith.constant 0 : index
    %c0_15 = arith.constant 0 : index
    %15 = vector.load %arg2[%c1, %c0_14, %c0_15] : memref<3x32x32xbf16, #tpu.memory_space<vmem>>, vector<1x32x32xbf16>
    %16 = vector.shape_cast %15 : vector<1x32x32xbf16> to vector<32x32xbf16>
    %cst_16 = arith.constant dense<0.000000e+00> : vector<8x32xf32>
    %17 = tpu.matmul %14, %16, %cst_16 {dimension_numbers = #tpu.dot_dimension_numbers<[1], [0], [0], [1], [0, 0, 1, 1], [], []>} : vector<8x32xbf16>, vector<32x32xbf16>, vector<8x32xf32> -> vector<8x32xf32>
    %18 = arith.addf %12, %17 : vector<8x32xf32>
    %c9 = arith.constant 9 : index
    %c0_17 = arith.constant 0 : index
    %19 = vector.load %arg7[%c9, %c0_17] : memref<24x32xf32, #tpu.memory_space<vmem>>, vector<8x32xf32>
    %20 = arith.truncf %19 : vector<8x32xf32> to vector<8x32xbf16>
    %c2 = arith.constant 2 : index
    %c0_18 = arith.constant 0 : index
    %c0_19 = arith.constant 0 : index
    %21 = vector.load %arg2[%c2, %c0_18, %c0_19] : memref<3x32x32xbf16, #tpu.memory_space<vmem>>, vector<1x32x32xbf16>
    %22 = vector.shape_cast %21 : vector<1x32x32xbf16> to vector<32x32xbf16>
    %cst_20 = arith.constant dense<0.000000e+00> : vector<8x32xf32>
    %23 = tpu.matmul %20, %22, %cst_20 {dimension_numbers = #tpu.dot_dimension_numbers<[1], [0], [0], [1], [0, 0, 1, 1], [], []>} : vector<8x32xbf16>, vector<32x32xbf16>, vector<8x32xf32> -> vector<8x32xf32>
    %24 = arith.addf %18, %23 : vector<8x32xf32>
    %c0_21 = arith.constant 0 : index
    %c0_22 = arith.constant 0 : index
    %25 = vector.load %arg3[%c0_21, %c0_22] : memref<1x32xf32, #tpu.memory_space<vmem>>, vector<1x32xf32>
    %26 = vector.broadcast %25 : vector<1x32xf32> to vector<8x32xf32>
    %27 = arith.addf %24, %26 : vector<8x32xf32>
    %cst_23 = arith.constant 0.000000e+00 : f32
    %28 = vector.broadcast %cst_23 : f32 to vector<8x32xf32>
    %29 = arith.maximumf %27, %28 : vector<8x32xf32>
    %c8_24 = arith.constant 8 : index
    %c0_25 = arith.constant 0 : index
    %30 = vector.load %arg7[%c8_24, %c0_25] : memref<24x32xf32, #tpu.memory_space<vmem>>, vector<8x32xf32>
    tpu.vector_store %arg7[%c8_24, %c0_25], %29 {strides = array<i32>} : memref<24x32xf32, #tpu.memory_space<vmem>>, vector<8x32xf32>,
    %c7_26 = arith.constant 7 : index
    %c0_27 = arith.constant 0 : index
    %31 = vector.load %arg7[%c7_26, %c0_27] : memref<24x32xf32, #tpu.memory_space<vmem>>, vector<8x32xf32>
    %32 = arith.truncf %31 : vector<8x32xf32> to vector<8x32xbf16>
    %c0_28 = arith.constant 0 : index
    %c0_29 = arith.constant 0 : index
    %c0_30 = arith.constant 0 : index
    %33 = vector.load %arg4[%c0_28, %c0_29, %c0_30] : memref<3x32x32xbf16, #tpu.memory_space<vmem>>, vector<1x32x32xbf16>
    %34 = vector.shape_cast %33 : vector<1x32x32xbf16> to vector<32x32xbf16>
    %cst_31 = arith.constant dense<0.000000e+00> : vector<8x32xf32>
    %35 = tpu.matmul %32, %34, %cst_31 {dimension_numbers = #tpu.dot_dimension_numbers<[1], [0], [0], [1], [0, 0, 1, 1], [], []>} : vector<8x32xbf16>, vector<32x32xbf16>, vector<8x32xf32> -> vector<8x32xf32>
    %c8_32 = arith.constant 8 : index
    %c0_33 = arith.constant 0 : index
    %36 = vector.load %arg7[%c8_32, %c0_33] : memref<24x32xf32, #tpu.memory_space<vmem>>, vector<8x32xf32>
    %37 = arith.truncf %36 : vector<8x32xf32> to vector<8x32xbf16>
    %c1_34 = arith.constant 1 : index
    %c0_35 = arith.constant 0 : index
    %c0_36 = arith.constant 0 : index
    %38 = vector.load %arg4[%c1_34, %c0_35, %c0_36] : memref<3x32x32xbf16, #tpu.memory_space<vmem>>, vector<1x32x32xbf16>
    %39 = vector.shape_cast %38 : vector<1x32x32xbf16> to vector<32x32xbf16>
    %cst_37 = arith.constant dense<0.000000e+00> : vector<8x32xf32>
    %40 = tpu.matmul %37, %39, %cst_37 {dimension_numbers = #tpu.dot_dimension_numbers<[1], [0], [0], [1], [0, 0, 1, 1], [], []>} : vector<8x32xbf16>, vector<32x32xbf16>, vector<8x32xf32> -> vector<8x32xf32>
    %41 = arith.addf %35, %40 : vector<8x32xf32>
    %c9_38 = arith.constant 9 : index
    %c0_39 = arith.constant 0 : index
    %42 = vector.load %arg7[%c9_38, %c0_39] : memref<24x32xf32, #tpu.memory_space<vmem>>, vector<8x32xf32>
    %43 = arith.truncf %42 : vector<8x32xf32> to vector<8x32xbf16>
    %c2_40 = arith.constant 2 : index
    %c0_41 = arith.constant 0 : index
    %c0_42 = arith.constant 0 : index
    %44 = vector.load %arg4[%c2_40, %c0_41, %c0_42] : memref<3x32x32xbf16, #tpu.memory_space<vmem>>, vector<1x32x32xbf16>
    %45 = vector.shape_cast %44 : vector<1x32x32xbf16> to vector<32x32xbf16>
    %cst_43 = arith.constant dense<0.000000e+00> : vector<8x32xf32>
    %46 = tpu.matmul %43, %45, %cst_43 {dimension_numbers = #tpu.dot_dimension_numbers<[1], [0], [0], [1], [0, 0, 1, 1], [], []>} : vector<8x32xbf16>, vector<32x32xbf16>, vector<8x32xf32> -> vector<8x32xf32>
    %47 = arith.addf %41, %46 : vector<8x32xf32>
    %c0_44 = arith.constant 0 : index
    %c0_45 = arith.constant 0 : index
    %48 = vector.load %arg5[%c0_44, %c0_45] : memref<1x32xf32, #tpu.memory_space<vmem>>, vector<1x32xf32>
    %49 = vector.broadcast %48 : vector<1x32xf32> to vector<8x32xf32>
    %50 = arith.addf %47, %49 : vector<8x32xf32>
    %51 = arith.addf %2, %50 : vector<8x32xf32>
    %52 = arith.truncf %51 : vector<8x32xf32> to vector<8x32xbf16>
    %c0_46 = arith.constant 0 : index
    %c0_47 = arith.constant 0 : index
    %c0_48 = arith.constant 0 : index
    %53 = vector.load %arg6[%c0_46, %c0_47, %c0_48] : memref<1x8x32xbf16, #tpu.memory_space<vmem>>, vector<1x8x32xbf16>
    %54 = vector.shape_cast %53 : vector<1x8x32xbf16> to vector<8x32xbf16>
    %55 = vector.shape_cast %52 : vector<8x32xbf16> to vector<1x8x32xbf16>
    tpu.vector_store %arg6[%c0_46, %c0_47, %c0_48], %55 {strides = array<i32>} : memref<1x8x32xbf16, #tpu.memory_space<vmem>>, vector<1x8x32xbf16>,
    return
  }
  func.func @transform_0(%arg0: i32) -> (i32, i32, i32) {
    %c0_i32 = arith.constant 0 : i32
    %c0_i32_0 = arith.constant 0 : i32
    %c0_i32_1 = arith.constant 0 : i32
    return %arg0, %c0_i32, %c0_i32_0 : i32, i32, i32
  }
  func.func @transform_1(%arg0: i32) -> (i32, i32, i32) {
    %c0_i32 = arith.constant 0 : i32
    %c0_i32_0 = arith.constant 0 : i32
    %c0_i32_1 = arith.constant 0 : i32
    %c0_i32_2 = arith.constant 0 : i32
    return %c0_i32, %c0_i32_0, %c0_i32_1 : i32, i32, i32
  }
  func.func @transform_2(%arg0: i32) -> (i32, i32) {
    %c0_i32 = arith.constant 0 : i32
    %c0_i32_0 = arith.constant 0 : i32
    %c0_i32_1 = arith.constant 0 : i32
    return %c0_i32, %c0_i32_0 : i32, i32
  }
  func.func @transform_3(%arg0: i32) -> (i32, i32, i32) {
    %c0_i32 = arith.constant 0 : i32
    %c0_i32_0 = arith.constant 0 : i32
    %c0_i32_1 = arith.constant 0 : i32
    %c0_i32_2 = arith.constant 0 : i32
    return %c0_i32, %c0_i32_0, %c0_i32_1 : i32, i32, i32
  }
  func.func @transform_4(%arg0: i32) -> (i32, i32) {
    %c0_i32 = arith.constant 0 : i32
    %c0_i32_0 = arith.constant 0 : i32
    %c0_i32_1 = arith.constant 0 : i32
    return %c0_i32, %c0_i32_0 : i32, i32
  }
  func.func @transform_5(%arg0: i32) -> (i32, i32, i32) {
    %c0_i32 = arith.constant 0 : i32
    %c0_i32_0 = arith.constant 0 : i32
    %c0_i32_1 = arith.constant 0 : i32
    return %arg0, %c0_i32, %c0_i32_0 : i32, i32, i32
  }
}

module attributes {stable_mosaic.version = 11 : i64} {
  func.func @_ffn_res_norm_kernel(%arg0: i32, %arg1: memref<16x32xbf16, #tpu.memory_space<vmem>>, %arg2: memref<1x32xf32, #tpu.memory_space<vmem>>, %arg3: memref<1x32xf32, #tpu.memory_space<vmem>>, %arg4: memref<32x128xbf16, #tpu.memory_space<vmem>>, %arg5: memref<1x128xf32, #tpu.memory_space<vmem>>, %arg6: memref<128x32xbf16, #tpu.memory_space<vmem>>, %arg7: memref<1x32xf32, #tpu.memory_space<vmem>>, %arg8: memref<1x32xf32, #tpu.memory_space<vmem>>, %arg9: memref<1x32xf32, #tpu.memory_space<vmem>>, %arg10: memref<16x32xbf16, #tpu.memory_space<vmem>>) attributes {dimension_semantics = [#tpu.dimension_semantics<parallel>], iteration_bounds = array<i64: 1>, scalar_prefetch = 0 : i64, scratch_operands = 0 : i64, tpu.core_type = #tpu.core_type<tc>, window_params = [{transform_indices = @transform_0, window_bounds = array<i64: 16, 32>}, {pipeline_mode = #tpu.pipeline_mode<synchronous>, transform_indices = @transform_1, window_bounds = array<i64: 1, 32>}, {pipeline_mode = #tpu.pipeline_mode<synchronous>, transform_indices = @transform_2, window_bounds = array<i64: 1, 32>}, {pipeline_mode = #tpu.pipeline_mode<synchronous>, transform_indices = @transform_3, window_bounds = array<i64: 32, 128>}, {pipeline_mode = #tpu.pipeline_mode<synchronous>, transform_indices = @transform_4, window_bounds = array<i64: 1, 128>}, {pipeline_mode = #tpu.pipeline_mode<synchronous>, transform_indices = @transform_5, window_bounds = array<i64: 128, 32>}, {pipeline_mode = #tpu.pipeline_mode<synchronous>, transform_indices = @transform_6, window_bounds = array<i64: 1, 32>}, {pipeline_mode = #tpu.pipeline_mode<synchronous>, transform_indices = @transform_7, window_bounds = array<i64: 1, 32>}, {pipeline_mode = #tpu.pipeline_mode<synchronous>, transform_indices = @transform_8, window_bounds = array<i64: 1, 32>}, {transform_indices = @transform_9, window_bounds = array<i64: 16, 32>}]} {
    %c0 = arith.constant 0 : index
    %c0_0 = arith.constant 0 : index
    %0 = vector.load %arg1[%c0, %c0_0] : memref<16x32xbf16, #tpu.memory_space<vmem>>, vector<16x32xbf16>
    %1 = arith.extf %0 : vector<16x32xbf16> to vector<16x32xf32>
    %c0_1 = arith.constant 0 : index
    %c0_2 = arith.constant 0 : index
    %2 = vector.load %arg2[%c0_1, %c0_2] : memref<1x32xf32, #tpu.memory_space<vmem>>, vector<1x32xf32>
    %c0_3 = arith.constant 0 : index
    %c0_4 = arith.constant 0 : index
    %3 = vector.load %arg3[%c0_3, %c0_4] : memref<1x32xf32, #tpu.memory_space<vmem>>, vector<1x32xf32>
    %c0_5 = arith.constant 0 : index
    %c0_6 = arith.constant 0 : index
    %4 = vector.load %arg5[%c0_5, %c0_6] : memref<1x128xf32, #tpu.memory_space<vmem>>, vector<1x128xf32>
    %c0_7 = arith.constant 0 : index
    %c0_8 = arith.constant 0 : index
    %5 = vector.load %arg7[%c0_7, %c0_8] : memref<1x32xf32, #tpu.memory_space<vmem>>, vector<1x32xf32>
    %cst = arith.constant dense<0.000000e+00> : vector<16xf32>
    %6 = vector.multi_reduction <add>, %1, %cst [1] : vector<16x32xf32> to vector<16xf32>
    %7 = vector.shape_cast %6 : vector<16xf32> to vector<16x1xf32>
    %cst_9 = arith.constant 3.200000e+01 : f32
    %8 = vector.broadcast %cst_9 : f32 to vector<16x1xf32>
    %9 = arith.divf %7, %8 : vector<16x1xf32>
    %10 = vector.broadcast %9 : vector<16x1xf32> to vector<16x32xf32>
    %11 = arith.subf %1, %10 : vector<16x32xf32>
    %12 = arith.mulf %11, %11 : vector<16x32xf32>
    %cst_10 = arith.constant dense<0.000000e+00> : vector<16xf32>
    %13 = vector.multi_reduction <add>, %12, %cst_10 [1] : vector<16x32xf32> to vector<16xf32>
    %14 = vector.shape_cast %13 : vector<16xf32> to vector<16x1xf32>
    %cst_11 = arith.constant 3.200000e+01 : f32
    %15 = vector.broadcast %cst_11 : f32 to vector<16x1xf32>
    %16 = arith.divf %14, %15 : vector<16x1xf32>
    %cst_12 = arith.constant 9.99999974E-6 : f32
    %17 = vector.broadcast %cst_12 : f32 to vector<16x1xf32>
    %18 = arith.addf %16, %17 : vector<16x1xf32>
    %19 = math.rsqrt %18 : vector<16x1xf32>
    %20 = vector.broadcast %19 : vector<16x1xf32> to vector<16x32xf32>
    %21 = arith.mulf %11, %20 : vector<16x32xf32>
    %22 = vector.broadcast %2 : vector<1x32xf32> to vector<16x32xf32>
    %23 = arith.mulf %21, %22 : vector<16x32xf32>
    %24 = vector.broadcast %3 : vector<1x32xf32> to vector<16x32xf32>
    %25 = arith.addf %23, %24 : vector<16x32xf32>
    %26 = arith.truncf %25 : vector<16x32xf32> to vector<16x32xbf16>
    %cst_13 = arith.constant 0.000000e+00 : f32
    %27 = vector.broadcast %cst_13 : f32 to vector<16x32xf32>
    %28 = vector.broadcast %5 : vector<1x32xf32> to vector<16x32xf32>
    %29 = arith.addf %28, %27 : vector<16x32xf32>
    %c0_14 = arith.constant 0 : index
    %c0_15 = arith.constant 0 : index
    %30 = vector.load %arg4[%c0_14, %c0_15] : memref<32x128xbf16, #tpu.memory_space<vmem>>, vector<32x128xbf16>
    %cst_16 = arith.constant dense<0.000000e+00> : vector<16x128xf32>
    %31 = tpu.matmul %26, %30, %cst_16 {dimension_numbers = #tpu.dot_dimension_numbers<[1], [0], [0], [1], [0, 0, 1, 1], [], []>} : vector<16x32xbf16>, vector<32x128xbf16>, vector<16x128xf32> -> vector<16x128xf32>
    %32 = vector.broadcast %4 : vector<1x128xf32> to vector<16x128xf32>
    %33 = arith.addf %31, %32 : vector<16x128xf32>
    %cst_17 = arith.constant 0.000000e+00 : f32
    %34 = vector.broadcast %cst_17 : f32 to vector<16x128xf32>
    %35 = arith.maximumf %33, %34 : vector<16x128xf32>
    %36 = arith.truncf %35 : vector<16x128xf32> to vector<16x128xbf16>
    %c0_18 = arith.constant 0 : index
    %c0_19 = arith.constant 0 : index
    %37 = vector.load %arg6[%c0_18, %c0_19] : memref<128x32xbf16, #tpu.memory_space<vmem>>, vector<128x32xbf16>
    %cst_20 = arith.constant dense<0.000000e+00> : vector<16x32xf32>
    %38 = tpu.matmul %36, %37, %cst_20 {dimension_numbers = #tpu.dot_dimension_numbers<[1], [0], [0], [1], [0, 0, 1, 1], [], []>} : vector<16x128xbf16>, vector<128x32xbf16>, vector<16x32xf32> -> vector<16x32xf32>
    %39 = arith.addf %29, %38 : vector<16x32xf32>
    %40 = arith.addf %1, %39 : vector<16x32xf32>
    %c0_21 = arith.constant 0 : index
    %c0_22 = arith.constant 0 : index
    %41 = vector.load %arg8[%c0_21, %c0_22] : memref<1x32xf32, #tpu.memory_space<vmem>>, vector<1x32xf32>
    %c0_23 = arith.constant 0 : index
    %c0_24 = arith.constant 0 : index
    %42 = vector.load %arg9[%c0_23, %c0_24] : memref<1x32xf32, #tpu.memory_space<vmem>>, vector<1x32xf32>
    %cst_25 = arith.constant dense<0.000000e+00> : vector<16xf32>
    %43 = vector.multi_reduction <add>, %40, %cst_25 [1] : vector<16x32xf32> to vector<16xf32>
    %44 = vector.shape_cast %43 : vector<16xf32> to vector<16x1xf32>
    %cst_26 = arith.constant 3.200000e+01 : f32
    %45 = vector.broadcast %cst_26 : f32 to vector<16x1xf32>
    %46 = arith.divf %44, %45 : vector<16x1xf32>
    %47 = vector.broadcast %46 : vector<16x1xf32> to vector<16x32xf32>
    %48 = arith.subf %40, %47 : vector<16x32xf32>
    %49 = arith.mulf %48, %48 : vector<16x32xf32>
    %cst_27 = arith.constant dense<0.000000e+00> : vector<16xf32>
    %50 = vector.multi_reduction <add>, %49, %cst_27 [1] : vector<16x32xf32> to vector<16xf32>
    %51 = vector.shape_cast %50 : vector<16xf32> to vector<16x1xf32>
    %cst_28 = arith.constant 3.200000e+01 : f32
    %52 = vector.broadcast %cst_28 : f32 to vector<16x1xf32>
    %53 = arith.divf %51, %52 : vector<16x1xf32>
    %cst_29 = arith.constant 9.99999974E-6 : f32
    %54 = vector.broadcast %cst_29 : f32 to vector<16x1xf32>
    %55 = arith.addf %53, %54 : vector<16x1xf32>
    %56 = math.rsqrt %55 : vector<16x1xf32>
    %57 = vector.broadcast %56 : vector<16x1xf32> to vector<16x32xf32>
    %58 = arith.mulf %48, %57 : vector<16x32xf32>
    %59 = vector.broadcast %41 : vector<1x32xf32> to vector<16x32xf32>
    %60 = arith.mulf %58, %59 : vector<16x32xf32>
    %61 = vector.broadcast %42 : vector<1x32xf32> to vector<16x32xf32>
    %62 = arith.addf %60, %61 : vector<16x32xf32>
    %63 = arith.truncf %62 : vector<16x32xf32> to vector<16x32xbf16>
    %c0_30 = arith.constant 0 : index
    %c0_31 = arith.constant 0 : index
    %64 = vector.load %arg10[%c0_30, %c0_31] : memref<16x32xbf16, #tpu.memory_space<vmem>>, vector<16x32xbf16>
    tpu.vector_store %arg10[%c0_30, %c0_31], %63 {strides = array<i32>} : memref<16x32xbf16, #tpu.memory_space<vmem>>, vector<16x32xbf16>,
    return
  }
  func.func @transform_0(%arg0: i32) -> (i32, i32) {
    %c0_i32 = arith.constant 0 : i32
    %c0_i32_0 = arith.constant 0 : i32
    return %arg0, %c0_i32 : i32, i32
  }
  func.func @transform_1(%arg0: i32) -> (i32, i32) {
    %c0_i32 = arith.constant 0 : i32
    %c0_i32_0 = arith.constant 0 : i32
    %c0_i32_1 = arith.constant 0 : i32
    return %c0_i32, %c0_i32_0 : i32, i32
  }
  func.func @transform_2(%arg0: i32) -> (i32, i32) {
    %c0_i32 = arith.constant 0 : i32
    %c0_i32_0 = arith.constant 0 : i32
    %c0_i32_1 = arith.constant 0 : i32
    return %c0_i32, %c0_i32_0 : i32, i32
  }
  func.func @transform_3(%arg0: i32) -> (i32, i32) {
    %c0_i32 = arith.constant 0 : i32
    %c0_i32_0 = arith.constant 0 : i32
    %c0_i32_1 = arith.constant 0 : i32
    return %c0_i32, %c0_i32_0 : i32, i32
  }
  func.func @transform_4(%arg0: i32) -> (i32, i32) {
    %c0_i32 = arith.constant 0 : i32
    %c0_i32_0 = arith.constant 0 : i32
    %c0_i32_1 = arith.constant 0 : i32
    return %c0_i32, %c0_i32_0 : i32, i32
  }
  func.func @transform_5(%arg0: i32) -> (i32, i32) {
    %c0_i32 = arith.constant 0 : i32
    %c0_i32_0 = arith.constant 0 : i32
    %c0_i32_1 = arith.constant 0 : i32
    return %c0_i32, %c0_i32_0 : i32, i32
  }
  func.func @transform_6(%arg0: i32) -> (i32, i32) {
    %c0_i32 = arith.constant 0 : i32
    %c0_i32_0 = arith.constant 0 : i32
    %c0_i32_1 = arith.constant 0 : i32
    return %c0_i32, %c0_i32_0 : i32, i32
  }
  func.func @transform_7(%arg0: i32) -> (i32, i32) {
    %c0_i32 = arith.constant 0 : i32
    %c0_i32_0 = arith.constant 0 : i32
    %c0_i32_1 = arith.constant 0 : i32
    return %c0_i32, %c0_i32_0 : i32, i32
  }
  func.func @transform_8(%arg0: i32) -> (i32, i32) {
    %c0_i32 = arith.constant 0 : i32
    %c0_i32_0 = arith.constant 0 : i32
    %c0_i32_1 = arith.constant 0 : i32
    return %c0_i32, %c0_i32_0 : i32, i32
  }
  func.func @transform_9(%arg0: i32) -> (i32, i32) {
    %c0_i32 = arith.constant 0 : i32
    %c0_i32_0 = arith.constant 0 : i32
    return %arg0, %c0_i32 : i32, i32
  }
}

module attributes {stable_mosaic.version = 11 : i64} {
  func.func @_layernorm_kernel(%arg0: i32, %arg1: memref<16x32xbf16, #tpu.memory_space<vmem>>, %arg2: memref<1x32xf32, #tpu.memory_space<vmem>>, %arg3: memref<1x32xf32, #tpu.memory_space<vmem>>, %arg4: memref<16x32xf32, #tpu.memory_space<vmem>>) attributes {dimension_semantics = [#tpu.dimension_semantics<parallel>], iteration_bounds = array<i64: 1>, scalar_prefetch = 0 : i64, scratch_operands = 0 : i64, tpu.core_type = #tpu.core_type<tc>, window_params = [{transform_indices = @transform_0, window_bounds = array<i64: 16, 32>}, {pipeline_mode = #tpu.pipeline_mode<synchronous>, transform_indices = @transform_1, window_bounds = array<i64: 1, 32>}, {pipeline_mode = #tpu.pipeline_mode<synchronous>, transform_indices = @transform_2, window_bounds = array<i64: 1, 32>}, {transform_indices = @transform_3, window_bounds = array<i64: 16, 32>}]} {
    %c0 = arith.constant 0 : index
    %c0_0 = arith.constant 0 : index
    %0 = vector.load %arg1[%c0, %c0_0] : memref<16x32xbf16, #tpu.memory_space<vmem>>, vector<16x32xbf16>
    %1 = arith.extf %0 : vector<16x32xbf16> to vector<16x32xf32>
    %c0_1 = arith.constant 0 : index
    %c0_2 = arith.constant 0 : index
    %2 = vector.load %arg2[%c0_1, %c0_2] : memref<1x32xf32, #tpu.memory_space<vmem>>, vector<1x32xf32>
    %c0_3 = arith.constant 0 : index
    %c0_4 = arith.constant 0 : index
    %3 = vector.load %arg3[%c0_3, %c0_4] : memref<1x32xf32, #tpu.memory_space<vmem>>, vector<1x32xf32>
    %cst = arith.constant dense<0.000000e+00> : vector<16xf32>
    %4 = vector.multi_reduction <add>, %1, %cst [1] : vector<16x32xf32> to vector<16xf32>
    %5 = vector.shape_cast %4 : vector<16xf32> to vector<16x1xf32>
    %cst_5 = arith.constant 3.200000e+01 : f32
    %6 = vector.broadcast %cst_5 : f32 to vector<16x1xf32>
    %7 = arith.divf %5, %6 : vector<16x1xf32>
    %8 = vector.broadcast %7 : vector<16x1xf32> to vector<16x32xf32>
    %9 = arith.subf %1, %8 : vector<16x32xf32>
    %10 = arith.mulf %9, %9 : vector<16x32xf32>
    %cst_6 = arith.constant dense<0.000000e+00> : vector<16xf32>
    %11 = vector.multi_reduction <add>, %10, %cst_6 [1] : vector<16x32xf32> to vector<16xf32>
    %12 = vector.shape_cast %11 : vector<16xf32> to vector<16x1xf32>
    %cst_7 = arith.constant 3.200000e+01 : f32
    %13 = vector.broadcast %cst_7 : f32 to vector<16x1xf32>
    %14 = arith.divf %12, %13 : vector<16x1xf32>
    %cst_8 = arith.constant 9.99999974E-6 : f32
    %15 = vector.broadcast %cst_8 : f32 to vector<16x1xf32>
    %16 = arith.addf %14, %15 : vector<16x1xf32>
    %17 = math.rsqrt %16 : vector<16x1xf32>
    %18 = vector.broadcast %17 : vector<16x1xf32> to vector<16x32xf32>
    %19 = arith.mulf %9, %18 : vector<16x32xf32>
    %20 = vector.broadcast %2 : vector<1x32xf32> to vector<16x32xf32>
    %21 = arith.mulf %19, %20 : vector<16x32xf32>
    %22 = vector.broadcast %3 : vector<1x32xf32> to vector<16x32xf32>
    %23 = arith.addf %21, %22 : vector<16x32xf32>
    %c0_9 = arith.constant 0 : index
    %c0_10 = arith.constant 0 : index
    %24 = vector.load %arg4[%c0_9, %c0_10] : memref<16x32xf32, #tpu.memory_space<vmem>>, vector<16x32xf32>
    tpu.vector_store %arg4[%c0_9, %c0_10], %23 {strides = array<i32>} : memref<16x32xf32, #tpu.memory_space<vmem>>, vector<16x32xf32>,
    return
  }
  func.func @transform_0(%arg0: i32) -> (i32, i32) {
    %c0_i32 = arith.constant 0 : i32
    %c0_i32_0 = arith.constant 0 : i32
    return %arg0, %c0_i32 : i32, i32
  }
  func.func @transform_1(%arg0: i32) -> (i32, i32) {
    %c0_i32 = arith.constant 0 : i32
    %c0_i32_0 = arith.constant 0 : i32
    %c0_i32_1 = arith.constant 0 : i32
    return %c0_i32, %c0_i32_0 : i32, i32
  }
  func.func @transform_2(%arg0: i32) -> (i32, i32) {
    %c0_i32 = arith.constant 0 : i32
    %c0_i32_0 = arith.constant 0 : i32
    %c0_i32_1 = arith.constant 0 : i32
    return %c0_i32, %c0_i32_0 : i32, i32
  }
  func.func @transform_3(%arg0: i32) -> (i32, i32) {
    %c0_i32 = arith.constant 0 : i32
    %c0_i32_0 = arith.constant 0 : i32
    return %arg0, %c0_i32 : i32, i32
  }
}

</mosaic_0001>

<bundles_post_ra>
// kernel: conformer_encoder_forward.11
= control target key start
LH: loop header
LB: loop body
LE: loop exit
PB: predicated region body
PF: predicated region fallthrough
CT: control target
= control target key end

     0   :  { %s1111_s18 = smov 0   ;;  %s1230_s0 = inlined_call_operand.vmem [shape: bf16[2,8,32], index: 0, kind: input, shape index: {}]   ;;  %s1231_s1 = inlined_call_operand.vmem [shape: bf16[32,96], index: 1, kind: input, shape index: {}]   ;;  %s1232_s2 = inlined_call_operand.vmem [shape: f32[1,96], index: 2, kind: input, shape index: {}]   ;;  %s1233_s3 = inlined_call_operand.vmem [shape: bf16[32,32], index: 3, kind: input, shape index: {}]   ;;  %s1234_s4 = inlined_call_operand.vmem [shape: f32[1,32], index: 4, kind: input, shape index: {}]   ;;  %s1235_s5 = inlined_call_operand.vmem [shape: bf16[2,8,32], index: 5, kind: output, shape index: {}]  }
   0x1 LB: > { %s894_s19 = sadd.s32 4294967295, %s1063_s18   ;;  %p898_p0 = scmp.ge.s32.totalorder %s1063_s18, 1  ;;  %s1063_s18 = sphi %s1111_s18, %s15_s18  }
   0x2   : > { %p186_p1 = scmp.lt.s32.totalorder %s1063_s18, 3 }
   0x4   : > { %p187_p2 = pnand %p898_p0, %p186_p1 }
   0x5   : > { %v1033_v0 = vld [vmem:[%s1231_s1] sm:$0xff] (!%p187_p2)   ;;  %v1065_v1 = vmov (!%p187_p2), 0.0   ;;  %v1034_v2 = vld [vmem:[%s1231_s1 + $0x8] sm:$0xff] (!%p187_p2)   ;;  %vm1066_vm0 = vmmov (!%p187_p2), 0   ;;  %p212_p3 = scmp.lt.s32.totalorder (!%p187_p2), %s894_s19, 1  ;;  %vm246_vm1 = vcmask (!%p187_p2), 261120  }
   0x6   : > { %190 = sbr.rel (%p187_p2) target bundleno = 1350 (0x546), region = 40  ;;  %945 = vmatprep.subr.bf16.mxu0 (!%p187_p2), %v1065_v1  ;;  %953 = vmatprep.subr.bf16.mxu1 (!%p187_p2), %v1065_v1  ;;  %v901_v4 = vld [vmem:[%s1232_s2] ss:$0 sm:$0xff] (!%p187_p2)  ;;  %vm291_vm2 = vcmask (!%p187_p2), 781312   ;;  %s1067_s30 = smov (!%p187_p2), 120   ;;  %vm299_vm3 = vcmask (!%p187_p2), 64512  }
   0x7   : > { %946 = vmatpush3.bf16.msra.mxu0 (!%p187_p2), %v1033_v0  ;;  %949 = vmatprep.mubr.msk.bf16.mxu0 (!%p187_p2), %vm1066_vm0, %v1065_v1  ;;  %s1068_s6 = smov (!%p187_p2), 96   ;;  %s1069_s7 = smov (!%p187_p2), 80   ;;  %vm362_vm4 = vcmask (!%p187_p2), 1043456   ;;  %vm526_vm5 = vcmask (!%p187_p2), 130112   ;;  %vm646_vm6 = vcmask (!%p187_p2), 195712   ;;  %vm766_vm7 = vcmask (!%p187_p2), 261312  }
   0x8   : > { %947 = vmatprep.subr.bf16.mxu0 (!%p187_p2), %v1065_v1  ;;  %955 = vmatprep.mubr.msk.bf16.mxu1 (!%p187_p2), %vm1066_vm0, %v1065_v1  ;;  %s1070_s8 = smov (!%p187_p2), 88   ;;  %s1071_s9 = smov (!%p187_p2), 72   ;;  %vm839_vm8 = vcmask (!%p187_p2), 257024  }
   0x9   : > { %s1072_s10 = smov (!%p187_p2), 112   ;;  %s1073_s11 = smov (!%p187_p2), 104  }
   0xa   : > { %s1074_s12 = smov (!%p187_p2), 56   ;;  %s1075_s13 = smov (!%p187_p2), 64  }
   0xb   : > { %948 = vmatpush3.bf16.msra.mxu0 (!%p187_p2), %v1034_v2  ;;  %s1076_s14 = smov (!%p187_p2), 40   ;;  %s1077_s15 = smov (!%p187_p2), 48  }
   0xc   : > { %959 = vmatprep.subr.bf16.mxu0 (!%p187_p2), %v1065_v1  ;;  %s1078_s16 = smov (!%p187_p2), 8   ;;  %s1079_s23 = smov (!%p187_p2), 16  }
   0xd   : > { %s1237_s19 = smov (!%p212_p3, %s894_s19), 1  ;;  %s1080_s25 = smov 24  }
   0xe   : > { %s899_s24 = sshll.u32 %s1237_s19, 2 }
   0xf   : > { %s215_s27 = scalar_lea.vmem %s1230_s0, %s899_s24 }
  0x10   : > { %v1141_v3 = vld [vmem:[%s215_s27] sm:$0xf] }
  0x11   : > { %950 = vmatmul.mubr.msk.bf16.vlgmr.msra.gmra.mrb[0].mxu0 %vm246_vm1, %v1141_v3 }
  0x12   : > { %961 = vmatprep.mubr.msk.bf16.mxu0 %vm1066_vm0, %v1065_v1 }
  0xe4   : > { %v284_v5 = vpop.f32.mrb[0].mxu0 }
  0xe5   : > { %v285_v6 = vadd.f32 %v901_v4, %v284_v5  ;;  %v951_v7 = vpop.f32.mrb[1].mxu0 }
  0xe6   : > { %v287_v8 = vpop.f32.mrb[2].mxu0 }
  0xe7   : > { %v290_v9 = vpack.c.bf16 %v285_v6, %v285_v6  ;;  %v952_v10 = vpop.f32.mrb[3].mxu0 }
  0xe9   : > { %292 = vst.msk [vmem:[#allocation2] sm:$0xf] %vm291_vm2, %v290_v9 }
  0xf0   : > { %v1150_v11 = vld [vmem:[#allocation2] ss:$0 sps:$4 sm:$0xff]  }
  0xf1   : > { %v293_v12 = vld [vmem:[#allocation2] sm:$0xf]  ;;  %412 = vrot.lane.b32.xlu1 %v1150_v11, %s1067_s30  ;;  %s219_s30 = scalar_lea.vmem %s1235_s5, %s899_s24 }
  0xf2   : > { %v1152_v13 = vcombine.low %v293_v12, %v293_v12  ;;  %v1156_v14 = vld [vmem:[#allocation2] ss:$0 sps:$4 sm:$0xff]  }
  0xf3   : > { %v1038_v15 = vld [vmem:[#allocation2] ss:$0 sps:$4 sm:$0xff]  }
  0xf4   : > { %297 = vrot.lane.b32.xlu0 %v1152_v13, %s1068_s6 }
  0xf5   : > { %534 = vrot.lane.b32.xlu1 %v1156_v14, %s1069_s7 }
  0xf8   : > { %414 = vrot.lane.b32.xlu0 %v1150_v11, %s1070_s8 }
  0xf9   : > { %654 = vrot.lane.b32.xlu1 %v1038_v15, %s1071_s9 }
  0xfc   : > { %532 = vrot.lane.b32.xlu0 %v1156_v14, %s1072_s10 }
 0x100   : > { %652 = vrot.lane.b32.xlu0 %v1038_v15, %s1073_s11 }
 0x163   : > { %v413_v19 = vpop.permute.xlu1 %412 }
 0x166   : > { %v298_v16 = vpop.permute.xlu0 %297 }
 0x167   : > { %v304_v17 = vsel %vm299_vm3, %v298_v16, 0  ;;  %v535_v21 = vpop.permute.xlu1 %534 }
 0x168   : > { %954 = vmatpush3.bf16.xpose.msra.mxu1 %v304_v17  ;;  %v540_v22 = vsel %vm299_vm3, %v535_v21, 0 }
 0x169   : > { %965 = vmatprep.subr.bf16.mxu1 %v1065_v1 }
 0x16a   : > { %v415_v18 = vpop.permute.xlu0 %414 }
 0x16b   : > { %v420_v20 = vsel %vm299_vm3, %v415_v18, 0  ;;  %v655_v23 = vpop.permute.xlu1 %654 }
 0x16c   : > { %v660_v25 = vsel %vm299_vm3, %v655_v23, 0 }
 0x16e   : > { %v533_v24 = vpop.permute.xlu0 %532 }
 0x16f   : > { %956 = vmatmul.mubr.msk.bf16.vlgmr.msra.gmra.mrb[0].mxu1 %vm299_vm3, %v293_v12 }
 0x170   : > { %966 = vmatpush3.bf16.xpose.msra.mxu1 %v420_v20  ;;  %967 = vmatprep.mubr.msk.bf16.mxu1 %vm1066_vm0, %v1065_v1 }
 0x171   : > { %977 = vmatprep.subr.bf16.mxu1 %v1065_v1 }
 0x172   : > { %v653_v26 = vpop.permute.xlu0 %652 }
 0x177   : > { %968 = vmatmul.mubr.msk.bf16.vlgmr.msra.gmra.mrb[4].mxu1 %vm299_vm3, %v413_v19 }
 0x178   : > { %978 = vmatpush3.bf16.xpose.msra.mxu1 %v540_v22  ;;  %979 = vmatprep.mubr.msk.bf16.mxu1 %vm1066_vm0, %v1065_v1 }
 0x179   : > { %989 = vmatprep.subr.bf16.mxu1 %v1065_v1 }
 0x17f   : > { %980 = vmatmul.mubr.msk.bf16.vlgmr.msra.gmra.mrb[8].mxu1 %vm299_vm3, %v533_v24 }
 0x180   : > { %990 = vmatpush3.bf16.xpose.msra.mxu1 %v660_v25  ;;  %991 = vmatprep.mubr.msk.bf16.mxu1 %vm1066_vm0, %v1065_v1 }
 0x181   : > { %1001 = vmatprep.subr.bf16.mxu1 %v1065_v1 }
 0x187   : > { %992 = vmatmul.mubr.msk.bf16.vlgmr.msra.gmra.mrb[12].mxu1 %vm299_vm3, %v653_v26 }
 0x188   : > { %1005 = vmatprep.mubr.msk.bf16.mxu1 %vm1066_vm0, %v1065_v1 }
 0x242   : > { %v340_v27 = vpop.f32.mrb[0].mxu1 }
 0x243   : > { %v957_v28 = vpop.f32.mrb[1].mxu1  ;;  %v346_v29 = vsel %vm299_vm3, %v340_v27, -inf }
 0x244   : > { %347 = vmax.xlane.f32.xlu1 %v346_v29  ;;  %v343_v30 = vpop.f32.mrb[2].mxu1 }
 0x245   : > { %v958_v31 = vpop.f32.mrb[3].mxu1 }
 0x24a   : > { %v456_v32 = vpop.f32.mrb[4].mxu1 }
 0x24b   : > { %v969_v33 = vpop.f32.mrb[5].mxu1  ;;  %v462_v34 = vsel %vm299_vm3, %v456_v32, -inf }
 0x24c   : > { %463 = vmax.xlane.f32.xlu0 %v462_v34  ;;  %v459_v35 = vpop.f32.mrb[6].mxu1  ;;  %v1039_v33 = vld [vmem:[%s1233_s3] sm:$0xff]  }
 0x24d   : > { %v970_v36 = vpop.f32.mrb[7].mxu1  ;;  %1002 = vmatpush3.bf16.msra.mxu1 %v1039_v33 }
 0x24e   : > { %1003 = vmatprep.subr.bf16.mxu1 %v1065_v1 }
 0x252   : > { %v576_v37 = vpop.f32.mrb[8].mxu1 }
 0x253   : > { %v981_v38 = vpop.f32.mrb[9].mxu1  ;;  %v582_v39 = vsel %vm299_vm3, %v576_v37, -inf }
 0x254   : > { %583 = vmax.xlane.f32.xlu0 %v582_v39  ;;  %v579_v40 = vpop.f32.mrb[10].mxu1  ;;  %v1040_v38 = vld [vmem:[%s1233_s3 + $0x8] sm:$0xff]  }
 0x255   : > { %473 = vrot.lane.b32.xlu1 %v1150_v11, %s1074_s12  ;;  %v982_v41 = vpop.f32.mrb[11].mxu1  ;;  %1004 = vmatpush3.bf16.msra.mxu1 %v1040_v38 }
 0x25a   : > { %v696_v42 = vpop.f32.mrb[12].mxu1 }
 0x25b   : > { %v993_v43 = vpop.f32.mrb[13].mxu1  ;;  %v702_v46 = vsel %vm299_vm3, %v696_v42, -inf }
 0x25c   : > { %v699_v44 = vpop.f32.mrb[14].mxu1 }
 0x25d   : > { %v994_v45 = vpop.f32.mrb[15].mxu1 }
 0x26a   : > { %357 = vrot.lane.b32.xlu0 %v1152_v13, %s1075_s13 }
 0x26e   : > { %713 = vrot.lane.b32.xlu0 %v1038_v15, %s1076_s14 }
 0x279   : > { %703 = vmax.xlane.f32.xlu1 %v702_v46 }
 0x28a   : > { %593 = vrot.lane.b32.xlu1 %v1156_v14, %s1077_s15 }
 0x2d1   : > { %v348_v47 = vpop.xlane.xlu1 %347 }
 0x2d2   : > { %v349_v48 = vsub.f32 %v340_v27, %v348_v47 }
 0x2d4   : > { %v350_v49 = vmul.f32 1.442695, %v349_v48 }
 0x2d5   : > { %v474_v59 = vpop.permute.xlu1 %473 }
 0x2d6   : > { %1041 = vpow2.f32 %v350_v49  ;;  %v479_v63 = vsel %vm362_vm4, %v474_v59, 0 }
 0x2d9   : > { %v464_v50 = vpop.xlane.xlu0 %463 }
 0x2da   : > { %v465_v51 = vsub.f32 %v456_v32, %v464_v50 }
 0x2dc   : > { %v466_v52 = vmul.f32 1.442695, %v465_v51  ;;  %v222_v51 = vunpack.c.l.bf16 %v1141_v3 }
 0x2de   : > { %1043 = vpow2.f32 %v466_v52 }
 0x2e0   : > { %v1042_v56 = vpop.eup %1041 }
 0x2e1   : > { %v584_v53 = vpop.xlane.xlu0 %583  ;;  %v356_v61 = vpack.c.bf16 %v1042_v56, %v1042_v56  ;;  %v352_v0 = vsel %vm299_vm3, %v1042_v56, 0.0 }
 0x2e2   : > { %v585_v54 = vsub.f32 %v576_v37, %v584_v53  ;;  %v920_v53 = vld [vmem:[%s1234_s4] ss:$0 sm:$0xff] }
 0x2e4   : > { %v586_v55 = vmul.f32 1.442695, %v585_v54 }
 0x2e5   : > { %v358_v57 = vpop.permute.xlu0 %357 }
 0x2e6   : > { %1045 = vpow2.f32 %v586_v55  ;;  %v364_v58 = vsel %vm362_vm4, %v358_v57, 0 }
 0x2e7   : > { %960 = vmatpush3.bf16.msra.mxu0 %v364_v58 }
 0x2e8   : > { %v1044_v60 = vpop.eup %1043  ;;  %971 = vmatprep.subr.bf16.mxu0 %v1065_v1 }
 0x2e9   : > { %v468_v62 = vsel %vm299_vm3, %v1044_v60, 0.0  ;;  %v472_v4 = vpack.c.bf16 %v1044_v60, %v1044_v60  ;;  %v714_v11 = vpop.permute.xlu0 %713 }
 0x2ea   : > { %469 = vadd.xlane.f32.xlu1 %v468_v62  ;;  %962 = vmatmul.mubr.msk.bf16.vlgmr.msra.gmra.mrb[4].mxu0 %vm299_vm3, %v356_v61  ;;  %v719_v13 = vsel %vm362_vm4, %v714_v11, 0 }
 0x2eb   : > { %972 = vmatpush3.bf16.msra.mxu0 %v479_v63  ;;  %973 = vmatprep.mubr.msk.bf16.mxu0 %vm1066_vm0, %v1065_v1 }
 0x2ec   : > { %983 = vmatprep.subr.bf16.mxu0 %v1065_v1 }
 0x2ee   : > { %353 = vadd.xlane.f32.xlu1 %v352_v0 }
 0x2f0   : > { %v1046_v2 = vpop.eup %1045 }
 0x2f1   : > { %v588_v5 = vsel %vm299_vm3, %v1046_v2, 0.0  ;;  %v592_v12 = vpack.c.bf16 %v1046_v2, %v1046_v2 }
 0x2f2   : > { %589 = vadd.xlane.f32.xlu0 %v588_v5  ;;  %974 = vmatmul.mubr.msk.bf16.vlgmr.msra.gmra.mrb[8].mxu0 %vm299_vm3, %v472_v4 }
 0x2f3   : > { %985 = vmatprep.mubr.msk.bf16.mxu0 %vm1066_vm0, %v1065_v1 }
 0x306   : > { %v704_v6 = vpop.xlane.xlu1 %703 }
 0x307   : > { %v705_v7 = vsub.f32 %v696_v42, %v704_v6 }
 0x309   : > { %v706_v8 = vmul.f32 1.442695, %v705_v7 }
 0x30a   : > { %v594_v9 = vpop.permute.xlu1 %593 }
 0x30b   : > { %1047 = vpow2.f32 %v706_v8  ;;  %v599_v10 = vsel %vm362_vm4, %v594_v9, 0 }
 0x30c   : > { %984 = vmatpush3.bf16.msra.mxu0 %v599_v10 }
 0x30d   : > { %995 = vmatprep.subr.bf16.mxu0 %v1065_v1 }
 0x30f   : > { %986 = vmatmul.mubr.msk.bf16.vlgmr.msra.gmra.mrb[12].mxu0 %vm299_vm3, %v592_v12 }
 0x310   : > { %996 = vmatpush3.bf16.msra.mxu0 %v719_v13  ;;  %997 = vmatprep.mubr.msk.bf16.mxu0 %vm1066_vm0, %v1065_v1 }
 0x315   : > { %v1048_v14 = vpop.eup %1047 }
 0x316   : > { %v708_v15 = vsel %vm299_vm3, %v1048_v14, 0.0  ;;  %v712_v16 = vpack.c.bf16 %v1048_v14, %v1048_v14 }
 0x317   : > { %709 = vadd.xlane.f32.xlu0 %v708_v15 }
 0x318   : > { %998 = vmatmul.mubr.msk.bf16.vlgmr.msra.gmra.mrb[16].mxu0 %vm299_vm3, %v712_v16 }
 0x377   : > { %v470_v17 = vpop.xlane.xlu1 %469 }
 0x37b   : > { %v354_v18 = vpop.xlane.xlu1 %353 }
 0x37c   : > { %1049 = vrcp.f32 %v354_v18 }
 0x37d   : > { %1051 = vrcp.f32 %v470_v17 }
 0x37f   : > { %v590_v31 = vpop.xlane.xlu0 %589 }
 0x380   : > { %1053 = vrcp.f32 %v590_v31 }
 0x386   : > { %v1050_v19 = vpop.eup %1049 }
 0x387   : > { %v1052_v25 = vpop.eup %1051 }
 0x38a   : > { %v1054_v34 = vpop.eup %1053 }
 0x3a4   : > { %v710_v32 = vpop.xlane.xlu0 %709 }
 0x3a5   : > { %1055 = vrcp.f32 %v710_v32 }
 0x3af   : > { %v1056_v41 = vpop.eup %1055 }
 0x3bd   : > { %v400_v20 = vpop.f32.mrb[4].mxu0 }
 0x3be   : > { %v406_v21 = vmul.f32 %v1050_v19, %v400_v20  ;;  %v963_v22 = vpop.f32.mrb[5].mxu0 }
 0x3bf   : > { %v403_v23 = vpop.f32.mrb[6].mxu0 }
 0x3c0   : > { %407 = vst.msk [vmem:[#allocation3] sm:$0xff] %vm299_vm3, %v406_v21  ;;  %v964_v24 = vpop.f32.mrb[7].mxu0 }
 0x3c5   : > { %v515_v26 = vpop.f32.mrb[8].mxu0 }
 0x3c6   : > { %v521_v27 = vmul.f32 %v1052_v25, %v515_v26  ;;  %v975_v28 = vpop.f32.mrb[9].mxu0 }
 0x3c7   : > { %v518_v29 = vpop.f32.mrb[10].mxu0 }
 0x3c8   : > { %523 = vrot.lane.b32.xlu0 %v521_v27, %s1078_s16  ;;  %v976_v30 = vpop.f32.mrb[11].mxu0 }
 0x3e2   : > { %v635_v35 = vpop.f32.mrb[12].mxu0 }
 0x3e3   : > { %v641_v36 = vmul.f32 %v1054_v34, %v635_v35  ;;  %v987_v37 = vpop.f32.mrb[13].mxu0 }
 0x3e4   : > { %v638_v39 = vpop.f32.mrb[14].mxu0 }
 0x3e5   : > { %643 = vrot.lane.b32.xlu1 %v641_v36, %s1079_s23  ;;  %v988_v40 = vpop.f32.mrb[15].mxu0 }
 0x3eb   : > { %v755_v42 = vpop.f32.mrb[16].mxu0 }
 0x3ec   : > { %v761_v43 = vmul.f32 %v1056_v41, %v755_v42  ;;  %v999_v44 = vpop.f32.mrb[17].mxu0 }
 0x3ed   : > { %v758_v45 = vpop.f32.mrb[18].mxu0 }
 0x3ee   : > { %763 = vrot.lane.b32.xlu1 %v761_v43, %s1080_s25  ;;  %v1000_v46 = vpop.f32.mrb[19].mxu0 }
 0x43a   : > { %v524_v47 = vpop.permute.xlu0 %523 }
 0x43b   : > { %527 = vst.msk [vmem:[#allocation3] sm:$0xff] %vm526_vm5, %v524_v47 }
 0x457   : > { %v644_v48 = vpop.permute.xlu1 %643 }
 0x458   : > { %647 = vst.msk [vmem:[#allocation3] sm:$0xff] %vm646_vm6, %v644_v48 }
 0x460   : > { %v764_v1 = vpop.permute.xlu1 %763 }
 0x461   : > { %767 = vst.msk [vmem:[#allocation3] sm:$0xff] %vm766_vm7, %v764_v1 }
 0x468   : > { %v768_v49 = vld [vmem:[#allocation3] sm:$0xff] }
 0x469   : > { %v769_v50 = vpack.c.bf16 %v768_v49, %v768_v49 }
 0x46b   : > { %1006 = vmatmul.mubr.msk.bf16.vlgmr.msra.gmra.mrb[16].mxu1 %vm246_vm1, %v769_v50 }
 0x53e   : > { %v823_v52 = vpop.f32.mrb[16].mxu1 }
 0x53f   : > { %v829_v54 = vadd.f32 %v823_v52, %v222_v51  ;;  %v1007_v55 = vpop.f32.mrb[17].mxu1 }
 0x540   : > { %v826_v56 = vpop.f32.mrb[18].mxu1 }
 0x541   : > { %v837_v57 = vadd.f32 %v920_v53, %v829_v54  ;;  %v1008_v58 = vpop.f32.mrb[19].mxu1 }
 0x543   : > { %v838_v59 = vpack.c.bf16 %v837_v57, %v837_v57 }
 0x545   : > { %840 = vst.msk [vmem:[%s219_s30] sm:$0xf] %vm839_vm8, %v838_v59 }
 0x546 PF: > { %s15_s18 = sadd.s32 1, %s1063_s18  }
 0x547   : > { %p12_p4 = scmp.ge.s32.totalorder %s15_s18, 4  }
 0x549   :  { %14 = sbr.rel (!%p12_p4) target bundleno = 1 (0x1), region = 70 }

// kernel: conformer_encoder_forward.10
= control target key start
LH: loop header
LB: loop body
LE: loop exit
PB: predicated region body
PF: predicated region fallthrough
CT: control target
= control target key end

     0   :  { %v111_v0 = vmov 0.0   ;;  %vm112_vm0 = vmmov 0   ;;  %vm33_vm1 = vcmask 130048   ;;  %vm86_vm2 = vcmask 257024   ;;  %s151_s1 = inlined_call_operand.vmem [shape: bf16[16,32], index: 1, kind: input, shape index: {}]   ;;  %s152_s0 = inlined_call_operand.vmem [shape: f32[16,16], index: 0, kind: input, shape index: {}]   ;;  %s153_s2 = inlined_call_operand.vmem [shape: f32[1,32], index: 2, kind: input, shape index: {}]   ;;  %s154_s3 = inlined_call_operand.vmem [shape: bf16[16,32], index: 3, kind: output, shape index: {}]  }
   0x1   :  { %102 = vmatprep.subr.bf16.mxu0 %v111_v0  ;;  %v110_v1 = vld [vmem:[%s151_s1] sm:$0xff]   ;;  %104 = vmatprep.mubr.msk.bf16.mxu0 %vm112_vm0, %v111_v0  ;;  %v16_v3 = vld [vmem:[%s152_s0 + $0x8] sm:$0xff] }
   0x2   :  { %v15_v2 = vld [vmem:[%s152_s0] sm:$0xff]  ;;  %103 = vmatpush3.bf16.msra.mxu0 %v110_v1 }
   0x3   :  { %v17_v4 = vpack.c.bf16 %v16_v3, %v15_v2  ;;  %v93_v5 = vld [vmem:[%s153_s2] ss:$0 sm:$0xff] }
   0x5   :  { %105 = vmatmul.mubr.msk.bf16.vlgmr.msra.gmra.mrb[0].mxu0 %vm33_vm1, %v17_v4 }
  0xd8   :  { %v71_v6 = vpop.f32.mrb[0].mxu0 }
  0xd9   :  { %v72_v7 = vadd.f32 %v93_v5, %v71_v6  ;;  %v106_v8 = vpop.f32.mrb[1].mxu0 }
  0xda   :  { %v74_v9 = vpop.f32.mrb[2].mxu0 }
  0xdb   :  { %v98_v10 = vpack.c.bf16 %v72_v7, %v72_v7  ;;  %v75_v11 = vadd.f32 %v93_v5, %v74_v9  ;;  %v107_v12 = vpop.f32.mrb[3].mxu0 }
  0xdd   :  { %87 = vst.msk [vmem:[%s154_s3] sm:$0xf] %vm86_vm2, %v98_v10  ;;  %v99_v13 = vpack.c.bf16 %v75_v11, %v75_v11 }
  0xdf   :  { %88 = vst.msk [vmem:[%s154_s3 + $0x4] sm:$0xf] %vm86_vm2, %v99_v13 }

// kernel: conformer_encoder_forward.12
= control target key start
LH: loop header
LB: loop body
LE: loop exit
PB: predicated region body
PF: predicated region fallthrough
CT: control target
= control target key end

     0   :  { %vm35_vm0 = vcmask 261120   ;;  %v359_v16 = vmov 0.0   ;;  %vm360_vm1 = vmmov 0   ;;  %vm273_vm2 = vcmask 257024   ;;  %s467_s0 = inlined_call_operand.vmem [shape: bf16[16,32], index: 0, kind: input, shape index: {}]   ;;  %s468_s3 = inlined_call_operand.vmem [shape: bf16[32,128], index: 3, kind: input, shape index: {}]   ;;  %s469_s5 = inlined_call_operand.vmem [shape: bf16[128,32], index: 5, kind: input, shape index: {}]   ;;  %s470_s1 = inlined_call_operand.vmem [shape: f32[1,32], index: 1, kind: input, shape index: {}]   ;;  %s471_s2 = inlined_call_operand.vmem [shape: f32[1,32], index: 2, kind: input, shape index: {}]   ;;  %s472_s4 = inlined_call_operand.vmem [shape: f32[1,128], index: 4, kind: input, shape index: {}]   ;;  %s473_s6 = inlined_call_operand.vmem [shape: f32[1,32], index: 6, kind: input, shape index: {}]   ;;  %s474_s7 = inlined_call_operand.vmem [shape: bf16[16,32], index: 7, kind: output, shape index: {}]  }
   0x1   :  { %v300_v0 = vld [vmem:[%s467_s0] sm:$0xff]   ;;  %315 = vmatprep.subr.bf16.mxu0 %v359_v16  ;;  %323 = vmatprep.subr.bf16.mxu1 %v359_v16  ;;  %v346_v17 = vld [vmem:[%s468_s3 + $0x8] sm:$0xff]   ;;  %v349_v20 = vld [vmem:[%s469_s5 + $0x10] sm:$0xff]  }
   0x2   :  { %v404_v1 = vunpack.c.l.bf16 %v300_v0  ;;  %v406_v2 = vunpack.c.h.bf16 %v300_v0  ;;  %v345_v15 = vld [vmem:[%s468_s3] sm:$0xff]   ;;  %319 = vmatprep.mubr.msk.bf16.mxu0 %vm360_vm1, %v359_v16  ;;  %339 = vmatprep.mubr.msk.bf16.mxu1 %vm360_vm1, %v359_v16  ;;  %v348_v19 = vld [vmem:[%s469_s5 + $0x8] sm:$0xff]   ;;  %v350_v21 = vld [vmem:[%s469_s5 + $0x18] sm:$0xff]  }
   0x3   :  { %316 = vmatpush3.bf16.msra.mxu0 %v345_v15  ;;  %v347_v18 = vld [vmem:[%s469_s5] sm:$0xff]   ;;  %v352_v23 = vld [vmem:[%s469_s5 + $0x28] sm:$0xff]   ;;  %v353_v41 = vld [vmem:[%s469_s5 + $0x30] sm:$0xff]  }
   0x4   :  { %v36_v3 = vsel %vm35_vm0, %v404_v1, 0.0  ;;  %v39_v4 = vsel %vm35_vm0, %v406_v2, 0.0  ;;  %317 = vmatprep.subr.bf16.mxu0 %v359_v16  ;;  %324 = vmatpush3.bf16.msra.mxu1 %v347_v18  ;;  %v351_v22 = vld [vmem:[%s469_s5 + $0x20] sm:$0xff]   ;;  %v354_v42 = vld [vmem:[%s469_s5 + $0x38] sm:$0xff]  }
   0x5   :  { %37 = vadd.xlane.f32.xlu0 %v36_v3  ;;  %325 = vmatprep.subr.bf16.mxu1 %v359_v16  ;;  %v280_v32 = vld [vmem:[%s470_s1] ss:$0 sm:$0xff] }
   0x6   :  { %v281_v36 = vld [vmem:[%s471_s2] ss:$0 sm:$0xff] }
   0x7   :  { %318 = vmatpush3.bf16.msra.mxu0 %v346_v17  ;;  %v283_v43 = vld [vmem:[%s472_s4] ss:$0 sm:$0xff] }
   0x8   :  { %326 = vmatpush3.bf16.msra.mxu1 %v348_v19  ;;  %v282_v53 = vld [vmem:[%s473_s6] ss:$0 sm:$0xff] }
   0x9   :  { %40 = vadd.xlane.f32.xlu0 %v39_v4  ;;  %327 = vmatprep.subr.bf16.mxu1 %v359_v16 }
   0xc   :  { %328 = vmatpush3.bf16.msra.mxu1 %v349_v20 }
   0xd   :  { %329 = vmatprep.subr.bf16.mxu1 %v359_v16 }
  0x10   :  { %330 = vmatpush3.bf16.msra.mxu1 %v350_v21 }
  0x11   :  { %331 = vmatprep.subr.bf16.mxu1 %v359_v16 }
  0x14   :  { %332 = vmatpush3.bf16.msra.mxu1 %v351_v22 }
  0x15   :  { %333 = vmatprep.subr.bf16.mxu1 %v359_v16 }
  0x18   :  { %334 = vmatpush3.bf16.msra.mxu1 %v352_v23 }
  0x19   :  { %335 = vmatprep.subr.bf16.mxu1 %v359_v16 }
  0x1c   :  { %336 = vmatpush3.bf16.msra.mxu1 %v353_v41 }
  0x1d   :  { %337 = vmatprep.subr.bf16.mxu1 %v359_v16 }
  0x20   :  { %338 = vmatpush3.bf16.msra.mxu1 %v354_v42 }
  0x92   :  { %v38_v5 = vpop.xlane.xlu0 %37 }
  0x93   :  { %v43_v6 = vmul.f32 0.03125, %v38_v5 }
  0x95   :  { %v45_v7 = vsub.f32 %v404_v1, %v43_v6 }
  0x96   :  { %v41_v8 = vpop.xlane.xlu0 %40 }
  0x97   :  { %v44_v9 = vmul.f32 0.03125, %v41_v8  ;;  %v47_v10 = vmul.f32 %v45_v7, %v45_v7 }
  0x99   :  { %v46_v11 = vsub.f32 %v406_v2, %v44_v9  ;;  %v49_v12 = vsel %vm35_vm0, %v47_v10, 0.0 }
  0x9a   :  { %50 = vadd.xlane.f32.xlu1 %v49_v12 }
  0x9b   :  { %v48_v13 = vmul.f32 %v46_v11, %v46_v11 }
  0x9d   :  { %v52_v14 = vsel %vm35_vm0, %v48_v13, 0.0 }
  0x9e   :  { %53 = vadd.xlane.f32.xlu1 %v52_v14 }
 0x127   :  { %v51_v24 = vpop.xlane.xlu1 %50 }
 0x128   :  { %v55_v25 = vmul.f32 0.03125, %v51_v24 }
 0x12a   :  { %v57_v26 = vadd.f32 1e-05, %v55_v25 }
 0x12b   :  { %v54_v27 = vpop.xlane.xlu1 %53 }
 0x12c   :  { %355 = vrsqrt.f32 %v57_v26  ;;  %v56_v28 = vmul.f32 0.03125, %v54_v27 }
 0x12e   :  { %v58_v29 = vadd.f32 1e-05, %v56_v28 }
 0x130   :  { %357 = vrsqrt.f32 %v58_v29 }
 0x136   :  { %v356_v30 = vpop.eup %355 }
 0x137   :  { %v61_v31 = vmul.f32 %v356_v30, %v45_v7 }
 0x139   :  { %v69_v35 = vmul.f32 %v280_v32, %v61_v31 }
 0x13a   :  { %v358_v33 = vpop.eup %357 }
 0x13b   :  { %v62_v34 = vmul.f32 %v358_v33, %v46_v11  ;;  %v77_v38 = vadd.f32 %v281_v36, %v69_v35 }
 0x13d   :  { %v70_v37 = vmul.f32 %v280_v32, %v62_v34 }
 0x13f   :  { %v78_v39 = vadd.f32 %v281_v36, %v70_v37 }
 0x141   :  { %v79_v40 = vpack.c.bf16 %v78_v39, %v77_v38 }
 0x143   :  { %320 = vmatmul.mubr.msk.bf16.vlgmr.msra.gmra.mrb[0].mxu0 %vm35_vm0, %v79_v40 }
 0x216   :  { %v146_v44 = vpop.f32.mrb[0].mxu0 }
 0x217   :  { %v147_v45 = vadd.f32 %v283_v43, %v146_v44  ;;  %v321_v46 = vpop.f32.mrb[1].mxu0 }
 0x218   :  { %v149_v47 = vpop.f32.mrb[2].mxu0 }
 0x219   :  { %v150_v48 = vadd.f32 %v283_v43, %v149_v47  ;;  %v322_v49 = vpop.f32.mrb[3].mxu0  ;;  %v153_v50 = vmax.f32 %v147_v45, 0.0 }
 0x21b   :  { %v154_v51 = vmax.f32 %v150_v48, 0.0 }
 0x21d   :  { %v155_v52 = vpack.c.bf16 %v154_v51, %v153_v50 }
 0x21f   :  { %340 = vmatmul.mubr.bf16.vlgmr.msra.gmra.mrb[0].mxu1 %v155_v52 }
 0x2f2   :  { %v254_v54 = vpop.f32.mrb[0].mxu1 }
 0x2f3   :  { %v261_v55 = vadd.f32 %v282_v53, %v254_v54  ;;  %v341_v56 = vpop.f32.mrb[1].mxu1 }
 0x2f4   :  { %v257_v57 = vpop.f32.mrb[2].mxu1 }
 0x2f5   :  { %v263_v58 = vadd.f32 %v404_v1, %v261_v55  ;;  %v262_v59 = vadd.f32 %v282_v53, %v257_v57  ;;  %v342_v60 = vpop.f32.mrb[3].mxu1 }
 0x2f7   :  { %v297_v61 = vpack.c.bf16 %v263_v58, %v263_v58  ;;  %v264_v62 = vadd.f32 %v406_v2, %v262_v59 }
 0x2f9   :  { %274 = vst.msk [vmem:[%s474_s7] sm:$0xf] %vm273_vm2, %v297_v61  ;;  %v298_v63 = vpack.c.bf16 %v264_v62, %v264_v62 }
 0x2fb   :  { %275 = vst.msk [vmem:[%s474_s7 + $0x4] sm:$0xf] %vm273_vm2, %v298_v63 }

// kernel: conformer_encoder_forward.13
= control target key start
LH: loop header
LB: loop body
LE: loop exit
PB: predicated region body
PF: predicated region fallthrough
CT: control target
= control target key end

     0   :  { %s847_s18 = smov 0   ;;  %s956_s0 = inlined_call_operand.vmem [shape: bf16[2,8,32], index: 0, kind: input, shape index: {}]   ;;  %s957_s1 = inlined_call_operand.vmem [shape: bf16[3,32,32], index: 1, kind: input, shape index: {}]   ;;  %s958_s2 = inlined_call_operand.vmem [shape: f32[1,32], index: 2, kind: input, shape index: {}]   ;;  %s959_s3 = inlined_call_operand.vmem [shape: bf16[3,32,32], index: 3, kind: input, shape index: {}]   ;;  %s960_s4 = inlined_call_operand.vmem [shape: f32[1,32], index: 4, kind: input, shape index: {}]   ;;  %s961_s5 = inlined_call_operand.vmem [shape: bf16[2,8,32], index: 5, kind: output, shape index: {}]  }
   0x1 LB: > { %s674_s19 = sadd.s32 4294967295, %s813_s18   ;;  %p678_p0 = scmp.ge.s32.totalorder %s813_s18, 1  ;;  %s813_s18 = sphi %s847_s18, %s15_s18  }
   0x2   : > { %p186_p1 = scmp.lt.s32.totalorder %s813_s18, 3 }
   0x4   : > { %p187_p2 = pnand %p678_p0, %p186_p1 }
   0x5   : > { %v795_v0 = vld [vmem:[%s957_s1 + $0x10] sm:$0xff] (!%p187_p2)   ;;  %v815_v1 = vmov (!%p187_p2), 0.0   ;;  %v796_v2 = vld [vmem:[%s957_s1] sm:$0xff] (!%p187_p2)   ;;  %v797_v3 = vld [vmem:[%s957_s1 + $0x18] sm:$0xff] (!%p187_p2)   ;;  %vm816_vm0 = vmmov (!%p187_p2), 0   ;;  %p212_p3 = scmp.lt.s32.totalorder (!%p187_p2), %s674_s19, 1 }
   0x6   : > { %190 = sbr.rel (%p187_p2) target bundleno = 494 (0x1ee), region = 40  ;;  %737 = vmatprep.subr.bf16.mxu0 (!%p187_p2), %v815_v1  ;;  %745 = vmatprep.subr.bf16.mxu1 (!%p187_p2), %v815_v1  ;;  %v798_v4 = vld [vmem:[%s957_s1 + $0x8] sm:$0xff] (!%p187_p2)   ;;  %vm223_vm1 = vcmask (!%p187_p2), 261120   ;;  %v799_v9 = vld [vmem:[%s957_s1 + $0x20] sm:$0xff] (!%p187_p2)   ;;  %v801_v15 = vld [vmem:[%s959_s3 + $0x10] sm:$0xff] (!%p187_p2)   ;;  %vm619_vm2 = vcmask (!%p187_p2), 257024  }
   0x7   : > { %738 = vmatpush3.bf16.msra.mxu0 (!%p187_p2), %v795_v0  ;;  %741 = vmatprep.mubr.msk.bf16.mxu0 (!%p187_p2), %vm816_vm0, %v815_v1  ;;  %224 = vst.msk [vmem:[#allocation2] sm:$0xff] (!%p187_p2), %vm223_vm1, %v815_v1  ;;  %225 = vst.msk [vmem:[#allocation2 + $0x10] sm:$0xff] (!%p187_p2), %vm223_vm1, %v815_v1  ;;  %v800_v12 = vld [vmem:[%s957_s1 + $0x28] sm:$0xff] (!%p187_p2)   ;;  %v802_v16 = vld [vmem:[%s959_s3] sm:$0xff] (!%p187_p2)  }
   0x8   : > { %746 = vmatpush3.bf16.msra.mxu1 (!%p187_p2), %v796_v2  ;;  %739 = vmatprep.subr.bf16.mxu0 (!%p187_p2), %v815_v1  ;;  %v803_v17 = vld [vmem:[%s959_s3 + $0x18] sm:$0xff] (!%p187_p2)   ;;  %v804_v18 = vld [vmem:[%s959_s3 + $0x8] sm:$0xff] (!%p187_p2)   ;;  %v698_v29 = vld [vmem:[%s958_s2] ss:$0 sm:$0xff] (!%p187_p2) }
   0x9   : > { %747 = vmatprep.subr.bf16.mxu1 (!%p187_p2), %v815_v1  ;;  %749 = vmatprep.mubr.msk.bf16.mxu1 (!%p187_p2), %vm816_vm0, %v815_v1  ;;  %v805_v38 = vld [vmem:[%s959_s3 + $0x20] sm:$0xff] (!%p187_p2)   ;;  %v806_v41 = vld [vmem:[%s959_s3 + $0x28] sm:$0xff] (!%p187_p2)  }
   0xa   : > { %v716_v54 = vld [vmem:[%s960_s4] ss:$0 sm:$0xff] (!%p187_p2) }
   0xb   : > { %740 = vmatpush3.bf16.msra.mxu0 (!%p187_p2), %v797_v3 }
   0xc   : > { %748 = vmatpush3.bf16.msra.mxu1 (!%p187_p2), %v798_v4  ;;  %753 = vmatprep.subr.bf16.mxu0 (!%p187_p2), %v815_v1 }
   0xd   : > { %s963_s19 = smov (!%p212_p3, %s674_s19), 1  ;;  %761 = vmatprep.subr.bf16.mxu1 %v815_v1 }
   0xe   : > { %s679_s28 = sshll.u32 %s963_s19, 2 }
   0xf   : > { %s215_s6 = scalar_lea.vmem %s956_s0, %s679_s28  ;;  %s219_s7 = scalar_lea.vmem %s961_s5, %s679_s28 }
  0x10   : > { %v888_v5 = vld [vmem:[%s215_s6] sm:$0xf] }
  0x11   : > { %v222_v6 = vunpack.c.l.bf16 %v888_v5 }
  0x13   : > { %226 = vst.msk [vmem:[#allocation2 + $0x8] sm:$0xff] %vm223_vm1, %v222_v6 }
  0x1a   : > { %v233_v7 = vld [vmem:[#allocation2 + $0x8] sm:$0xff] }
  0x1b   : > { %v227_v8 = vld [vmem:[#allocation2 + $0x7] sm:$0xff]  ;;  %v234_v10 = vpack.c.bf16 %v233_v7, %v233_v7 }
  0x1c   : > { %v228_v11 = vpack.c.bf16 %v227_v8, %v227_v8  ;;  %v350_v13 = vld [vmem:[#allocation2 + $0x9] sm:$0xff] }
  0x1d   : > { %742 = vmatmul.mubr.msk.bf16.vlgmr.msra.gmra.mrb[0].mxu0 %vm223_vm1, %v234_v10  ;;  %v351_v14 = vpack.c.bf16 %v350_v13, %v350_v13 }
  0x1e   : > { %750 = vmatmul.mubr.msk.bf16.vlgmr.msra.gmra.mrb[0].mxu1 %vm223_vm1, %v228_v11  ;;  %754 = vmatpush3.bf16.msra.mxu0 %v799_v9 }
  0x1f   : > { %757 = vmatprep.mubr.msk.bf16.mxu0 %vm816_vm0, %v815_v1  ;;  %755 = vmatprep.subr.bf16.mxu0 %v815_v1 }
  0x20   : > { %765 = vmatprep.mubr.msk.bf16.mxu1 %vm816_vm0, %v815_v1  ;;  %762 = vmatpush3.bf16.msra.mxu1 %v801_v15 }
  0x21   : > { %763 = vmatprep.subr.bf16.mxu1 %v815_v1 }
  0x22   : > { %756 = vmatpush3.bf16.msra.mxu0 %v800_v12 }
  0x23   : > { %769 = vmatprep.subr.bf16.mxu0 %v815_v1 }
  0x24   : > { %764 = vmatpush3.bf16.msra.mxu1 %v803_v17 }
  0x25   : > { %758 = vmatmul.mubr.msk.bf16.vlgmr.msra.gmra.mrb[4].mxu0 %vm223_vm1, %v351_v14  ;;  %777 = vmatprep.subr.bf16.mxu1 %v815_v1 }
  0x26   : > { %773 = vmatprep.mubr.msk.bf16.mxu0 %vm816_vm0, %v815_v1  ;;  %770 = vmatpush3.bf16.msra.mxu0 %v802_v16 }
  0x27   : > { %771 = vmatprep.subr.bf16.mxu0 %v815_v1 }
  0x2a   : > { %772 = vmatpush3.bf16.msra.mxu0 %v804_v18 }
  0xf0   : > { %v289_v19 = vpop.f32.mrb[0].mxu0 }
  0xf1   : > { %v344_v20 = vpop.f32.mrb[0].mxu1  ;;  %v743_v22 = vpop.f32.mrb[1].mxu0 }
  0xf2   : > { %v345_v21 = vadd.f32 %v344_v20, %v289_v19  ;;  %v751_v23 = vpop.f32.mrb[1].mxu1  ;;  %v292_v24 = vpop.f32.mrb[2].mxu0 }
  0xf3   : > { %v347_v25 = vpop.f32.mrb[2].mxu1  ;;  %v744_v26 = vpop.f32.mrb[3].mxu0 }
  0xf4   : > { %v752_v27 = vpop.f32.mrb[3].mxu1 }
  0xf8   : > { %v406_v28 = vpop.f32.mrb[4].mxu0 }
  0xf9   : > { %v412_v30 = vadd.f32 %v406_v28, %v345_v21  ;;  %v759_v31 = vpop.f32.mrb[5].mxu0 }
  0xfa   : > { %v409_v32 = vpop.f32.mrb[6].mxu0 }
  0xfb   : > { %v420_v33 = vadd.f32 %v698_v29, %v412_v30  ;;  %v760_v34 = vpop.f32.mrb[7].mxu0 }
  0xfd   : > { %v421_v35 = vmax.f32 %v420_v33, 0.0 }
  0xff   : > { %422 = vst.msk [vmem:[#allocation2 + $0x8] sm:$0xff] %vm223_vm1, %v421_v35 }
 0x106   : > { %v429_v36 = vld [vmem:[#allocation2 + $0x8] sm:$0xff] }
 0x107   : > { %v423_v37 = vld [vmem:[#allocation2 + $0x7] sm:$0xff]  ;;  %v430_v39 = vpack.c.bf16 %v429_v36, %v429_v36 }
 0x108   : > { %v424_v40 = vpack.c.bf16 %v423_v37, %v423_v37  ;;  %v546_v42 = vld [vmem:[#allocation2 + $0x9] sm:$0xff] }
 0x109   : > { %766 = vmatmul.mubr.msk.bf16.vlgmr.msra.gmra.mrb[4].mxu1 %vm223_vm1, %v430_v39  ;;  %v547_v43 = vpack.c.bf16 %v546_v42, %v546_v42 }
 0x10a   : > { %774 = vmatmul.mubr.msk.bf16.vlgmr.msra.gmra.mrb[8].mxu0 %vm223_vm1, %v424_v40  ;;  %778 = vmatpush3.bf16.msra.mxu1 %v805_v38 }
 0x10b   : > { %781 = vmatprep.mubr.msk.bf16.mxu1 %vm816_vm0, %v815_v1  ;;  %779 = vmatprep.subr.bf16.mxu1 %v815_v1 }
 0x10e   : > { %780 = vmatpush3.bf16.msra.mxu1 %v806_v41 }
 0x111   : > { %782 = vmatmul.mubr.msk.bf16.vlgmr.msra.gmra.mrb[8].mxu1 %vm223_vm1, %v547_v43 }
 0x1dc   : > { %v485_v44 = vpop.f32.mrb[4].mxu1 }
 0x1dd   : > { %v540_v45 = vpop.f32.mrb[8].mxu0  ;;  %v767_v47 = vpop.f32.mrb[5].mxu1 }
 0x1de   : > { %v541_v46 = vadd.f32 %v540_v45, %v485_v44  ;;  %v775_v48 = vpop.f32.mrb[9].mxu0  ;;  %v488_v49 = vpop.f32.mrb[6].mxu1 }
 0x1df   : > { %v543_v50 = vpop.f32.mrb[10].mxu0  ;;  %v768_v51 = vpop.f32.mrb[7].mxu1 }
 0x1e0   : > { %v776_v52 = vpop.f32.mrb[11].mxu0 }
 0x1e4   : > { %v602_v53 = vpop.f32.mrb[8].mxu1 }
 0x1e5   : > { %v608_v55 = vadd.f32 %v602_v53, %v541_v46  ;;  %v783_v56 = vpop.f32.mrb[9].mxu1 }
 0x1e6   : > { %v605_v57 = vpop.f32.mrb[10].mxu1 }
 0x1e7   : > { %v616_v58 = vadd.f32 %v716_v54, %v608_v55  ;;  %v784_v59 = vpop.f32.mrb[11].mxu1 }
 0x1e9   : > { %v617_v60 = vadd.f32 %v616_v58, %v222_v6 }
 0x1eb   : > { %v618_v61 = vpack.c.bf16 %v617_v60, %v617_v60 }
 0x1ed   : > { %620 = vst.msk [vmem:[%s219_s7] sm:$0xf] %vm619_vm2, %v618_v61 }
 0x1ee PF: > { %s15_s18 = sadd.s32 1, %s813_s18  }
 0x1ef   : > { %p12_p4 = scmp.ge.s32.totalorder %s15_s18, 4  }
 0x1f1   :  { %14 = sbr.rel (!%p12_p4) target bundleno = 1 (0x1), region = 74 }

// kernel: conformer_encoder_forward.19
= control target key start
LH: loop header
LB: loop body
LE: loop exit
PB: predicated region body
PF: predicated region fallthrough
CT: control target
= control target key end

     0   :  { %vm21_vm0 = vcmask 261120   ;;  %s170_s0 = inlined_call_operand.vmem [shape: bf16[16,32], index: 0, kind: input, shape index: {}]   ;;  %s171_s1 = inlined_call_operand.vmem [shape: f32[1,32], index: 1, kind: input, shape index: {}]   ;;  %s172_s2 = inlined_call_operand.vmem [shape: f32[1,32], index: 2, kind: input, shape index: {}]   ;;  %s173_s3 = inlined_call_operand.hbm [shape: f32[16,32], index: 3, kind: output, shape index: {}]  }
   0x1   :  { %v86_v0 = vld [vmem:[%s170_s0] sm:$0xff]  }
   0x2   :  { %8 = vsyncpa [#allocation3], 0  ;;  %v87_v1 = vunpack.c.l.bf16 %v86_v0  ;;  %v88_v2 = vunpack.c.h.bf16 %v86_v0  ;;  %v83_v22 = vld [vmem:[%s171_s1] ss:$0 sm:$0xff]  ;;  %s120_s17 = smov [#allocation2]  }
   0x3   :  { %v84_v24 = vld [vmem:[%s172_s2] ss:$0 sm:$0xff]  ;;  %s72_s18 = sshll.u32 %s120_s17, 4  ;;  %s73_s18 = int_to_ptr.vmem [resolvable:$true] %s72_s18 }
   0x4   :  { %v22_v3 = vsel %vm21_vm0, %v87_v1, 0.0  ;;  %v25_v4 = vsel %vm21_vm0, %v88_v2, 0.0  ;;  %s96_s19 = scalar_lea.vmem %s73_s18, 256  ;;  %p101_p1 = scmp.lt.s32.totalorder %s73_s18, %s73_s18 }
   0x5   :  { %23 = vadd.xlane.f32.xlu0 %v22_v3  ;;  %p97_p0 = scmp.ne.s32.totalorder %s73_s18, %s96_s19  ;;  %p102_p2 = scmp.lt.s32.totalorder %s96_s19, %s96_s19 }
   0x7   :  { %p103_p3 = por %p102_p2, %p101_p1 }
   0x9   :  { %26 = vadd.xlane.f32.xlu0 %v25_v4  ;;  %p104_p4 = pnand %p103_p3, %p97_p0 }
  0x92   :  { %v24_v5 = vpop.xlane.xlu0 %23 }
  0x93   :  { %v29_v6 = vmul.f32 0.03125, %v24_v5 }
  0x95   :  { %v31_v7 = vsub.f32 %v87_v1, %v29_v6 }
  0x96   :  { %v27_v8 = vpop.xlane.xlu0 %26 }
  0x97   :  { %v30_v9 = vmul.f32 0.03125, %v27_v8  ;;  %v33_v10 = vmul.f32 %v31_v7, %v31_v7 }
  0x99   :  { %v32_v11 = vsub.f32 %v88_v2, %v30_v9  ;;  %v35_v12 = vsel %vm21_vm0, %v33_v10, 0.0 }
  0x9a   :  { %36 = vadd.xlane.f32.xlu1 %v35_v12 }
  0x9b   :  { %v34_v13 = vmul.f32 %v32_v11, %v32_v11 }
  0x9d   :  { %v38_v14 = vsel %vm21_vm0, %v34_v13, 0.0 }
  0x9e   :  { %39 = vadd.xlane.f32.xlu1 %v38_v14 }
 0x127   :  { %v37_v15 = vpop.xlane.xlu1 %36 }
 0x128   :  { %v41_v16 = vmul.f32 0.03125, %v37_v15 }
 0x12a   :  { %v43_v17 = vadd.f32 1e-05, %v41_v16 }
 0x12b   :  { %v40_v18 = vpop.xlane.xlu1 %39 }
 0x12c   :  { %92 = vrsqrt.f32 %v43_v17  ;;  %v42_v19 = vmul.f32 0.03125, %v40_v18 }
 0x12e   :  { %v44_v20 = vadd.f32 1e-05, %v42_v19 }
 0x130   :  { %94 = vrsqrt.f32 %v44_v20 }
 0x136   :  { %v93_v21 = vpop.eup %92 }
 0x137   :  { %v47_v23 = vmul.f32 %v93_v21, %v31_v7 }
 0x139   :  { %v55_v25 = vmul.f32 %v83_v22, %v47_v23 }
 0x13a   :  { %v95_v26 = vpop.eup %94 }
 0x13b   :  { %v48_v27 = vmul.f32 %v95_v26, %v32_v11  ;;  %v63_v28 = vadd.f32 %v84_v24, %v55_v25 }
 0x13d   :  { %v56_v29 = vmul.f32 %v83_v22, %v48_v27  ;;  %65 = vst.msk [vmem:[#allocation2] sm:$0xff] %vm21_vm0, %v63_v28 }
 0x13f   :  { %v64_v30 = vadd.f32 %v84_v24, %v56_v29 }
 0x141   :  { %66 = vst.msk [vmem:[#allocation2 + $0x8] sm:$0xff] %vm21_vm0, %v64_v30 }
 0x142   :  { %107 = shalt.err (!%p104_p4)
}
 0x143   :  { %s108_s20 = scalar_lea.hbm %s173_s3, 256 }
 0x144   :  { %p109_p5 = scmp.ne.s32.totalorder %s173_s3, %s108_s20  ;;  %p112_p6 = scmp.lt.u32.totalorder %s108_s20, %s173_s3 }
 0x146   :  { %p114_p7 = pnand %p112_p6, %p109_p5 }
 0x148   :  { %117 = shalt.err (!%p114_p7)
}
 0x149   :  { %s121_s25 = smov 128   ;;  %s122_s26 = smov 8  }
 0x14a   :  { %78 = dma.vmem_to_hbm [thread:$0]  %s73_s18, 256, %s173_s3, [#allocation3], %s121_s25, %s121_s25, %s122_s26  }
 0x14b   :  { %118 = dma.done.wait [#allocation3], 256  }
 0x14c   :  { %119 = vsyncadd [#allocation3], 4294967040 }
 0x14d   :  { %82 = vsyncpa [#allocation3], 1 }

// kernel: conformer_encoder_forward.14
= control target key start
LH: loop header
LB: loop body
LE: loop exit
PB: predicated region body
PF: predicated region fallthrough
CT: control target
= control target key end

     0   :  { %vm41_vm0 = vcmask 261120   ;;  %v415_v16 = vmov 0.0   ;;  %vm416_vm1 = vmmov 0   ;;  %vm323_vm2 = vcmask 257024   ;;  %s543_s0 = inlined_call_operand.vmem [shape: bf16[16,32], index: 0, kind: input, shape index: {}]   ;;  %s544_s3 = inlined_call_operand.vmem [shape: bf16[32,128], index: 3, kind: input, shape index: {}]   ;;  %s545_s5 = inlined_call_operand.vmem [shape: bf16[128,32], index: 5, kind: input, shape index: {}]   ;;  %s546_s1 = inlined_call_operand.vmem [shape: f32[1,32], index: 1, kind: input, shape index: {}]   ;;  %s547_s2 = inlined_call_operand.vmem [shape: f32[1,32], index: 2, kind: input, shape index: {}]   ;;  %s548_s4 = inlined_call_operand.vmem [shape: f32[1,128], index: 4, kind: input, shape index: {}]   ;;  %s549_s6 = inlined_call_operand.vmem [shape: f32[1,32], index: 6, kind: input, shape index: {}]   ;;  %s550_s7 = inlined_call_operand.vmem [shape: f32[1,32], index: 7, kind: input, shape index: {}]   ;;  %s551_s8 = inlined_call_operand.vmem [shape: f32[1,32], index: 8, kind: input, shape index: {}]   ;;  %s552_s9 = inlined_call_operand.vmem [shape: bf16[16,32], index: 9, kind: output, shape index: {}]  }
   0x1   :  { %v352_v0 = vld [vmem:[%s543_s0] sm:$0xff]   ;;  %367 = vmatprep.subr.bf16.mxu0 %v415_v16  ;;  %375 = vmatprep.subr.bf16.mxu1 %v415_v16  ;;  %v398_v17 = vld [vmem:[%s544_s3 + $0x8] sm:$0xff]   ;;  %v401_v20 = vld [vmem:[%s545_s5 + $0x10] sm:$0xff]  }
   0x2   :  { %v470_v1 = vunpack.c.l.bf16 %v352_v0  ;;  %v472_v2 = vunpack.c.h.bf16 %v352_v0  ;;  %v397_v15 = vld [vmem:[%s544_s3] sm:$0xff]   ;;  %371 = vmatprep.mubr.msk.bf16.mxu0 %vm416_vm1, %v415_v16  ;;  %391 = vmatprep.mubr.msk.bf16.mxu1 %vm416_vm1, %v415_v16  ;;  %v400_v19 = vld [vmem:[%s545_s5 + $0x8] sm:$0xff]   ;;  %v402_v21 = vld [vmem:[%s545_s5 + $0x18] sm:$0xff]  }
   0x3   :  { %368 = vmatpush3.bf16.msra.mxu0 %v397_v15  ;;  %v399_v18 = vld [vmem:[%s545_s5] sm:$0xff]   ;;  %v404_v23 = vld [vmem:[%s545_s5 + $0x28] sm:$0xff]   ;;  %v405_v41 = vld [vmem:[%s545_s5 + $0x30] sm:$0xff]  }
   0x4   :  { %v42_v3 = vsel %vm41_vm0, %v470_v1, 0.0  ;;  %v45_v4 = vsel %vm41_vm0, %v472_v2, 0.0  ;;  %369 = vmatprep.subr.bf16.mxu0 %v415_v16  ;;  %376 = vmatpush3.bf16.msra.mxu1 %v399_v18  ;;  %v403_v22 = vld [vmem:[%s545_s5 + $0x20] sm:$0xff]   ;;  %v406_v42 = vld [vmem:[%s545_s5 + $0x38] sm:$0xff]  }
   0x5   :  { %43 = vadd.xlane.f32.xlu0 %v42_v3  ;;  %377 = vmatprep.subr.bf16.mxu1 %v415_v16  ;;  %v330_v32 = vld [vmem:[%s546_s1] ss:$0 sm:$0xff] }
   0x6   :  { %v331_v36 = vld [vmem:[%s547_s2] ss:$0 sm:$0xff] }
   0x7   :  { %370 = vmatpush3.bf16.msra.mxu0 %v398_v17  ;;  %v333_v43 = vld [vmem:[%s548_s4] ss:$0 sm:$0xff] }
   0x8   :  { %378 = vmatpush3.bf16.msra.mxu1 %v400_v19  ;;  %v332_v53 = vld [vmem:[%s549_s6] ss:$0 sm:$0xff] }
   0x9   :  { %46 = vadd.xlane.f32.xlu0 %v45_v4  ;;  %379 = vmatprep.subr.bf16.mxu1 %v415_v16  ;;  %v345_v17 = vld [vmem:[%s550_s7] ss:$0 sm:$0xff] }
   0xc   :  { %380 = vmatpush3.bf16.msra.mxu1 %v401_v20  ;;  %v346_v20 = vld [vmem:[%s551_s8] ss:$0 sm:$0xff] }
   0xd   :  { %381 = vmatprep.subr.bf16.mxu1 %v415_v16 }
  0x10   :  { %382 = vmatpush3.bf16.msra.mxu1 %v402_v21 }
  0x11   :  { %383 = vmatprep.subr.bf16.mxu1 %v415_v16 }
  0x14   :  { %384 = vmatpush3.bf16.msra.mxu1 %v403_v22 }
  0x15   :  { %385 = vmatprep.subr.bf16.mxu1 %v415_v16 }
  0x18   :  { %386 = vmatpush3.bf16.msra.mxu1 %v404_v23 }
  0x19   :  { %387 = vmatprep.subr.bf16.mxu1 %v415_v16 }
  0x1c   :  { %388 = vmatpush3.bf16.msra.mxu1 %v405_v41 }
  0x1d   :  { %389 = vmatprep.subr.bf16.mxu1 %v415_v16 }
  0x20   :  { %390 = vmatpush3.bf16.msra.mxu1 %v406_v42 }
  0x92   :  { %v44_v5 = vpop.xlane.xlu0 %43 }
  0x93   :  { %v49_v6 = vmul.f32 0.03125, %v44_v5 }
  0x95   :  { %v51_v7 = vsub.f32 %v470_v1, %v49_v6 }
  0x96   :  { %v47_v8 = vpop.xlane.xlu0 %46 }
  0x97   :  { %v50_v9 = vmul.f32 0.03125, %v47_v8  ;;  %v53_v10 = vmul.f32 %v51_v7, %v51_v7 }
  0x99   :  { %v52_v11 = vsub.f32 %v472_v2, %v50_v9  ;;  %v55_v12 = vsel %vm41_vm0, %v53_v10, 0.0 }
  0x9a   :  { %56 = vadd.xlane.f32.xlu1 %v55_v12 }
  0x9b   :  { %v54_v13 = vmul.f32 %v52_v11, %v52_v11 }
  0x9d   :  { %v58_v14 = vsel %vm41_vm0, %v54_v13, 0.0 }
  0x9e   :  { %59 = vadd.xlane.f32.xlu1 %v58_v14 }
 0x127   :  { %v57_v24 = vpop.xlane.xlu1 %56 }
 0x128   :  { %v61_v25 = vmul.f32 0.03125, %v57_v24 }
 0x12a   :  { %v63_v26 = vadd.f32 1e-05, %v61_v25 }
 0x12b   :  { %v60_v27 = vpop.xlane.xlu1 %59 }
 0x12c   :  { %407 = vrsqrt.f32 %v63_v26  ;;  %v62_v28 = vmul.f32 0.03125, %v60_v27 }
 0x12e   :  { %v64_v29 = vadd.f32 1e-05, %v62_v28 }
 0x130   :  { %409 = vrsqrt.f32 %v64_v29 }
 0x136   :  { %v408_v30 = vpop.eup %407 }
 0x137   :  { %v67_v31 = vmul.f32 %v408_v30, %v51_v7 }
 0x139   :  { %v75_v35 = vmul.f32 %v330_v32, %v67_v31 }
 0x13a   :  { %v410_v33 = vpop.eup %409 }
 0x13b   :  { %v68_v34 = vmul.f32 %v410_v33, %v52_v11  ;;  %v83_v38 = vadd.f32 %v331_v36, %v75_v35 }
 0x13d   :  { %v76_v37 = vmul.f32 %v330_v32, %v68_v34 }
 0x13f   :  { %v84_v39 = vadd.f32 %v331_v36, %v76_v37 }
 0x141   :  { %v85_v40 = vpack.c.bf16 %v84_v39, %v83_v38 }
 0x143   :  { %372 = vmatmul.mubr.msk.bf16.vlgmr.msra.gmra.mrb[0].mxu0 %vm41_vm0, %v85_v40 }
 0x216   :  { %v152_v44 = vpop.f32.mrb[0].mxu0 }
 0x217   :  { %v153_v45 = vadd.f32 %v333_v43, %v152_v44  ;;  %v373_v46 = vpop.f32.mrb[1].mxu0 }
 0x218   :  { %v155_v47 = vpop.f32.mrb[2].mxu0 }
 0x219   :  { %v156_v48 = vadd.f32 %v333_v43, %v155_v47  ;;  %v374_v49 = vpop.f32.mrb[3].mxu0  ;;  %v159_v50 = vmax.f32 %v153_v45, 0.0 }
 0x21b   :  { %v160_v51 = vmax.f32 %v156_v48, 0.0 }
 0x21d   :  { %v161_v52 = vpack.c.bf16 %v160_v51, %v159_v50 }
 0x21f   :  { %392 = vmatmul.mubr.bf16.vlgmr.msra.gmra.mrb[0].mxu1 %v161_v52 }
 0x2f2   :  { %v260_v54 = vpop.f32.mrb[0].mxu1 }
 0x2f3   :  { %v267_v55 = vadd.f32 %v332_v53, %v260_v54  ;;  %v393_v56 = vpop.f32.mrb[1].mxu1 }
 0x2f4   :  { %v263_v57 = vpop.f32.mrb[2].mxu1 }
 0x2f5   :  { %v268_v58 = vadd.f32 %v332_v53, %v263_v57  ;;  %v394_v59 = vpop.f32.mrb[3].mxu1  ;;  %v269_v60 = vadd.f32 %v470_v1, %v267_v55 }
 0x2f7   :  { %v273_v61 = vsel %vm41_vm0, %v269_v60, 0.0  ;;  %v270_v62 = vadd.f32 %v472_v2, %v268_v58 }
 0x2f8   :  { %274 = vadd.xlane.f32.xlu0 %v273_v61 }
 0x2f9   :  { %v276_v63 = vsel %vm41_vm0, %v270_v62, 0.0 }
 0x2fa   :  { %277 = vadd.xlane.f32.xlu1 %v276_v63 }
 0x385   :  { %v275_v0 = vpop.xlane.xlu0 %274 }
 0x386   :  { %v279_v3 = vmul.f32 0.03125, %v275_v0 }
 0x387   :  { %v278_v4 = vpop.xlane.xlu1 %277 }
 0x388   :  { %v281_v5 = vsub.f32 %v269_v60, %v279_v3  ;;  %v280_v6 = vmul.f32 0.03125, %v278_v4 }
 0x38a   :  { %v282_v7 = vsub.f32 %v270_v62, %v280_v6  ;;  %v283_v8 = vmul.f32 %v281_v5, %v281_v5 }
 0x38c   :  { %v285_v9 = vsel %vm41_vm0, %v283_v8, 0.0  ;;  %v284_v10 = vmul.f32 %v282_v7, %v282_v7 }
 0x38d   :  { %286 = vadd.xlane.f32.xlu0 %v285_v9 }
 0x38e   :  { %v288_v1 = vsel %vm41_vm0, %v284_v10, 0.0 }
 0x38f   :  { %289 = vadd.xlane.f32.xlu1 %v288_v1 }
 0x41a   :  { %v287_v11 = vpop.xlane.xlu0 %286 }
 0x41b   :  { %v291_v2 = vmul.f32 0.03125, %v287_v11 }
 0x41c   :  { %v290_v12 = vpop.xlane.xlu1 %289 }
 0x41d   :  { %v293_v13 = vadd.f32 1e-05, %v291_v2  ;;  %v292_v14 = vmul.f32 0.03125, %v290_v12 }
 0x41f   :  { %411 = vrsqrt.f32 %v293_v13  ;;  %v294_v15 = vadd.f32 1e-05, %v292_v14 }
 0x421   :  { %413 = vrsqrt.f32 %v294_v15 }
 0x429   :  { %v412_v16 = vpop.eup %411 }
 0x42a   :  { %v297_v18 = vmul.f32 %v412_v16, %v281_v5 }
 0x42b   :  { %v414_v19 = vpop.eup %413 }
 0x42c   :  { %v305_v21 = vmul.f32 %v345_v17, %v297_v18  ;;  %v298_v22 = vmul.f32 %v414_v19, %v282_v7 }
 0x42e   :  { %v313_v23 = vadd.f32 %v346_v20, %v305_v21  ;;  %v306_v24 = vmul.f32 %v345_v17, %v298_v22 }
 0x430   :  { %v349_v25 = vpack.c.bf16 %v313_v23, %v313_v23  ;;  %v314_v26 = vadd.f32 %v346_v20, %v306_v24 }
 0x432   :  { %324 = vst.msk [vmem:[%s552_s9] sm:$0xf] %vm323_vm2, %v349_v25  ;;  %v350_v27 = vpack.c.bf16 %v314_v26, %v314_v26 }
 0x434   :  { %325 = vst.msk [vmem:[%s552_s9 + $0x4] sm:$0xf] %vm323_vm2, %v350_v27 }

</bundles_post_ra>
